<compile_context>
chip_gen: v6e
topology: v6e:2x2x1
jax: 0.10.0
libtpu: 0.0.40
codegen_flags: <defaults>
</compile_context>

<pallas_src>
import functools

import jax
import jax.numpy as jnp
from jax import lax
from jax.experimental import pallas as pl
from jax.experimental.pallas import tpu as pltpu


def _encoder_kernel(src_ref, pos_ref, mask_ref,
                    wqk_ref, bqk_ref, wv_ref, bv_ref, wo_ref, bo_ref,
                    w1_ref, b1_ref, w2_ref, b2_ref,
                    g1_ref, be1_ref, g2_ref, be2_ref,
                    out_ref, *, nhead, has_mask):
    """One (batch, layer) grid step of the encoder stack."""
    layer = pl.program_id(1)

    # Layer 0: seed the resident activation block with the input.
    @pl.when(layer == 0)
    def _():
        out_ref[...] = src_ref[...]

    x = out_ref[...]                       # (S, D) f32, resident activations
    p = pos_ref[...]                       # (S, D) f32

    S, D = x.shape
    hd = D // nhead
    cdt = wqk_ref.dtype                    # MXU compute dtype (bf16)

    # ---- fused Q/K projection (scale folded into the Q half host-side) ----
    qk_in = (x + p).astype(cdt)
    qk = jnp.dot(qk_in, wqk_ref[...], preferred_element_type=jnp.float32) + bqk_ref[...]
    v = jnp.dot(x.astype(cdt), wv_ref[...], preferred_element_type=jnp.float32) + bv_ref[...]

    q_c = qk[:, :D].astype(cdt)
    k_c = qk[:, D:].astype(cdt)
    v_c = v.astype(cdt)
    wo = wo_ref[...]                       # (D, D) pre-transposed

    if has_mask:
        mask = mask_ref[...]               # (1, S) additive key-padding bias (f32)

    # ---- per-head attention with folded output projection ----
    #      (no concatenate, no explicit K transpose; softmax stats in f32)
    attn_out = jnp.zeros((S, D), jnp.float32)
    for h in range(nhead):                 # static, fully unrolled
        sl = slice(h * hd, (h + 1) * hd)
        logits = lax.dot_general(q_c[:, sl], k_c[:, sl],
                                 (((1,), (1,)), ((), ())),
                                 preferred_element_type=jnp.float32)
        if has_mask:
            logits = logits + mask
        logits = logits - jnp.max(logits, axis=-1, keepdims=True)
        e = jnp.exp(logits)
        inv = pl.reciprocal(jnp.sum(e, axis=-1, keepdims=True), approx=True)
        probs = (e * inv).astype(cdt)
        ctx = jnp.dot(probs, v_c[:, sl], preferred_element_type=jnp.float32)   # (S, hd)
        attn_out = attn_out + jnp.dot(ctx.astype(cdt), wo[sl, :],
                                      preferred_element_type=jnp.float32)
    attn_out = attn_out + bo_ref[...]

    def layer_norm(y, g, b):
        mu = jnp.mean(y, axis=-1, keepdims=True)
        var = jnp.mean(jnp.square(y - mu), axis=-1, keepdims=True)
        return (y - mu) * lax.rsqrt(var + 1e-5) * g + b

    # residual + norm1 (dropout1 == identity in eval)
    y = layer_norm(x + attn_out, g1_ref[...], be1_ref[...])

    # ---- feed-forward: Linear -> ReLU -> Linear (dropout == identity) ----
    h1 = jnp.dot(y.astype(cdt), w1_ref[...], preferred_element_type=jnp.float32) + b1_ref[...]
    h1 = jnp.maximum(h1, 0.0)
    ffn = jnp.dot(h1.astype(cdt), w2_ref[...], preferred_element_type=jnp.float32) + b2_ref[...]

    # residual + norm2 (dropout2 == identity in eval)
    y = layer_norm(y + ffn, g2_ref[...], be2_ref[...])
    out_ref[...] = y.astype(out_ref.dtype)


def _prepare_params(params, nhead, compute_dtype):
    """Host-side (one-time) layout plumbing: transpose, fuse QK, fold scale, cast."""
    D = params["wo"].shape[0]
    FF = params["w1"].shape[0]
    hd = D // nhead
    scale = 1.0 / float(hd) ** 0.5

    wqkv = params["wqkv"].astype(jnp.float32)          # (3D, D) PyTorch in_proj_weight
    bqkv = params["bqkv"].reshape(3 * D).astype(jnp.float32)
    wq_t = wqkv[0:D].T * scale                         # (D, D), scale folded
    wk_t = wqkv[D:2 * D].T
    wv_t = wqkv[2 * D:3 * D].T
    bq = bqkv[0:D] * scale
    bk = bqkv[D:2 * D]
    bv = bqkv[2 * D:3 * D]

    return dict(
        wqk=jnp.concatenate([wq_t, wk_t], axis=1).astype(compute_dtype),   # (D, 2D)
        bqk=jnp.concatenate([bq, bk]).reshape(1, 2 * D).astype(jnp.float32),
        wv=wv_t.astype(compute_dtype),                                     # (D, D)
        bv=bv.reshape(1, D).astype(jnp.float32),
        wo=params["wo"].T.astype(compute_dtype),                           # (D, D)
        bo=params["bo"].reshape(1, D).astype(jnp.float32),
        w1=params["w1"].T.astype(compute_dtype),                           # (D, FF)
        b1=params["b1"].reshape(1, FF).astype(jnp.float32),
        w2=params["w2"].T.astype(compute_dtype),                           # (FF, D)
        b2=params["b2"].reshape(1, D).astype(jnp.float32),
        g1=params["g1"].reshape(1, D).astype(jnp.float32),
        be1=params["be1"].reshape(1, D).astype(jnp.float32),
        g2=params["g2"].reshape(1, D).astype(jnp.float32),
        be2=params["be2"].reshape(1, D).astype(jnp.float32),
    )


def transformer_encoder(src_sbd, pos_sbd, params, *, nhead, num_layers,
                        padding_mask=None, compute_dtype=jnp.bfloat16):
    """src_sbd, pos_sbd: [HW, B, D] (PyTorch layout); padding_mask: [B, HW] bool."""
    src_bsd = jnp.transpose(src_sbd, (1, 0, 2)).astype(jnp.float32)
    pos_bsd = jnp.transpose(pos_sbd, (1, 0, 2)).astype(jnp.float32)
    B, S, D = src_bsd.shape
    FF = params["w1"].shape[0]

    has_mask = padding_mask is not None
    if has_mask:
        mask_add = jnp.where(padding_mask, -1e30, 0.0).astype(jnp.float32).reshape(B, 1, S)
    else:
        mask_add = jnp.zeros((B, 1, S), jnp.float32)   # DMA'd but never read

    kp = _prepare_params(params, nhead, compute_dtype)
    kernel = functools.partial(_encoder_kernel, nhead=nhead, has_mask=has_mask)

    def per_batch(tail):
        return pl.BlockSpec((pl.Squeezed(),) + tail,
                            lambda b, l: (b,) + (0,) * len(tail))

    def full(shape):
        n = len(shape)
        return pl.BlockSpec(shape, lambda b, l, _n=n: (0,) * _n)

    out_bsd = pl.pallas_call(
        kernel,
        out_shape=jax.ShapeDtypeStruct((B, S, D), jnp.float32),
        grid=(B, num_layers),
        in_specs=[
            per_batch((S, D)),                 # src
            per_batch((S, D)),                 # pos
            per_batch((1, S)),                 # additive key-padding mask
            full((D, 2 * D)),                  # fused [Wq|Wk] (pre-transposed, q-scaled)
            full((1, 2 * D)),                  # fused [bq|bk]
            full((D, D)),                      # Wv (pre-transposed)
            full((1, D)),                      # bv
            full((D, D)),                      # out_proj weight (pre-transposed)
            full((1, D)),                      # out_proj bias
            full((D, FF)),                     # ffn linear1 weight (pre-transposed)
            full((1, FF)),                     # ffn linear1 bias
            full((FF, D)),                     # ffn linear2 weight (pre-transposed)
            full((1, D)),                      # ffn linear2 bias
            full((1, D)), full((1, D)),        # norm1 gamma / beta
            full((1, D)), full((1, D)),        # norm2 gamma / beta
        ],
        out_specs=per_batch((S, D)),
        compiler_params=pltpu.CompilerParams(
            dimension_semantics=("parallel", "arbitrary"),
            vmem_limit_bytes=32 * 1024 * 1024),
    )(src_bsd, pos_bsd, mask_add,
      kp["wqk"], kp["bqk"], kp["wv"], kp["bv"], kp["wo"], kp["bo"],
      kp["w1"], kp["b1"], kp["w2"], kp["b2"],
      kp["g1"], kp["be1"], kp["g2"], kp["be2"])

    return jnp.transpose(out_bsd, (1, 0, 2))   # back to [HW, B, D]


# ----------------------- pure-JAX f32 reference (for checking) ----------------------

def _layer_norm_ref(y, g, b, eps=1e-5):
    mu = jnp.mean(y, axis=-1, keepdims=True)
    var = jnp.mean(jnp.square(y - mu), axis=-1, keepdims=True)
    return (y - mu) / jnp.sqrt(var + eps) * g + b


def transformer_encoder_ref(src, pos, params, *, nhead, num_layers, padding_mask=None):
    """src, pos: [HW, B, D] f32. Mirrors the PyTorch module in float32."""
    S, B, D = src.shape
    hd = D // nhead
    wqkv, bqkv = params["wqkv"], params["bqkv"]
    wq, wk, wv = wqkv[:D], wqkv[D:2 * D], wqkv[2 * D:]
    bq, bk, bv = bqkv[:D], bqkv[D:2 * D], bqkv[2 * D:]
    x = src
    for _ in range(num_layers):
        qk_in = x + pos
        q = qk_in @ wq.T + bq
        k = qk_in @ wk.T + bk
        v = x @ wv.T + bv
        qh = q.reshape(S, B, nhead, hd)
        kh = k.reshape(S, B, nhead, hd)
        vh = v.reshape(S, B, nhead, hd)
        logits = jnp.einsum('sbhd,tbhd->bhst', qh, kh) * (1.0 / float(hd) ** 0.5)
        if padding_mask is not None:
            logits = logits + jnp.where(padding_mask, -1e30, 0.0)[:, None, None, :]
        probs = jax.nn.softmax(logits, axis=-1)
        ctx = jnp.einsum('bhst,tbhd->sbhd', probs, vh).reshape(S, B, D)
        attn = ctx @ params["wo"].T + params["bo"]
        x = _layer_norm_ref(x + attn, params["g1"], params["be1"])
        h1 = jnp.maximum(x @ params["w1"].T + params["b1"], 0.0)
        ffn = h1 @ params["w2"].T + params["b2"]
        x = _layer_norm_ref(x + ffn, params["g2"], params["be2"])
    return x


def init_params(key, d_model, nhead, dim_feedforward):
    ks = jax.random.split(key, 8)
    s = 0.05
    return {
        "wqkv": jax.random.normal(ks[0], (3 * d_model, d_model), jnp.float32) * s,
        "bqkv": jax.random.normal(ks[1], (3 * d_model,), jnp.float32) * s,
        "wo":   jax.random.normal(ks[2], (d_model, d_model), jnp.float32) * s,
        "bo":   jax.random.normal(ks[3], (d_model,), jnp.float32) * s,
        "w1":   jax.random.normal(ks[4], (dim_feedforward, d_model), jnp.float32) * s,
        "b1":   jax.random.normal(ks[5], (dim_feedforward,), jnp.float32) * s,
        "w2":   jax.random.normal(ks[6], (d_model, dim_feedforward), jnp.float32) * s,
        "b2":   jax.random.normal(ks[7], (d_model,), jnp.float32) * s,
        "g1":   jnp.ones((d_model,), jnp.float32),
        "be1":  jnp.zeros((d_model,), jnp.float32),
        "g2":   jnp.ones((d_model,), jnp.float32),
        "be2":  jnp.zeros((d_model,), jnp.float32),
    }


if __name__ == "__main__":
    d_model, nhead, dim_feedforward, num_layers = 32, 4, 64, 2
    HW, B = 16, 2   # flattened spatial sequence length and batch

    key = jax.random.PRNGKey(0)
    k_src, k_pos, k_param = jax.random.split(key, 3)
    src = jax.random.normal(k_src, (HW, B, d_model), jnp.float32)
    pos = jax.random.normal(k_pos, (HW, B, d_model), jnp.float32)
    params = init_params(k_param, d_model, nhead, dim_feedforward)

    # --- no key-padding mask ---
    out = transformer_encoder(src, pos, params, nhead=nhead,
                              num_layers=num_layers, padding_mask=None)
    out = jax.block_until_ready(out)
    assert out.shape == (HW, B, d_model)
    assert bool(jnp.all(jnp.isfinite(out)))
    ref = transformer_encoder_ref(src, pos, params, nhead=nhead, num_layers=num_layers)
    assert float(jnp.max(jnp.abs(out - ref))) < 0.1   # bf16 MXU vs f32 reference

    # --- with a key-padding mask (last 3 keys of batch element 1 are padding) ---
    padding_mask = jnp.zeros((B, HW), jnp.bool_).at[1, -3:].set(True)
    out_m = transformer_encoder(src, pos, params, nhead=nhead,
                                num_layers=num_layers, padding_mask=padding_mask)
    out_m = jax.block_until_ready(out_m)
    assert bool(jnp.all(jnp.isfinite(out_m)))
    ref_m = transformer_encoder_ref(src, pos, params, nhead=nhead,
                                    num_layers=num_layers, padding_mask=padding_mask)
    assert float(jnp.max(jnp.abs(out_m - ref_m))) < 0.1

    print("KERNEL_OK")
</pallas_src>

<mosaic_0001>
module attributes {stable_mosaic.version = 11 : i64} {
  func.func @_encoder_kernel(%arg0: i32, %arg1: i32, %arg2: memref<1x16x32xf32, #tpu.memory_space<vmem>>, %arg3: memref<1x16x32xf32, #tpu.memory_space<vmem>>, %arg4: memref<1x1x16xf32, #tpu.memory_space<vmem>>, %arg5: memref<32x64xbf16, #tpu.memory_space<vmem>>, %arg6: memref<1x64xf32, #tpu.memory_space<vmem>>, %arg7: memref<32x32xbf16, #tpu.memory_space<vmem>>, %arg8: memref<1x32xf32, #tpu.memory_space<vmem>>, %arg9: memref<32x32xbf16, #tpu.memory_space<vmem>>, %arg10: memref<1x32xf32, #tpu.memory_space<vmem>>, %arg11: memref<32x64xbf16, #tpu.memory_space<vmem>>, %arg12: memref<1x64xf32, #tpu.memory_space<vmem>>, %arg13: memref<64x32xbf16, #tpu.memory_space<vmem>>, %arg14: memref<1x32xf32, #tpu.memory_space<vmem>>, %arg15: memref<1x32xf32, #tpu.memory_space<vmem>>, %arg16: memref<1x32xf32, #tpu.memory_space<vmem>>, %arg17: memref<1x32xf32, #tpu.memory_space<vmem>>, %arg18: memref<1x32xf32, #tpu.memory_space<vmem>>, %arg19: memref<1x16x32xf32, #tpu.memory_space<vmem>>) attributes {dimension_semantics = [#tpu.dimension_semantics<parallel>, #tpu.dimension_semantics<arbitrary>], iteration_bounds = array<i64: 2, 2>, scalar_prefetch = 0 : i64, scratch_operands = 0 : i64, tpu.core_type = #tpu.core_type<tc>, window_params = [{transform_indices = @transform_0, window_bounds = array<i64: 1, 16, 32>}, {transform_indices = @transform_1, window_bounds = array<i64: 1, 16, 32>}, {transform_indices = @transform_2, window_bounds = array<i64: 1, 1, 16>}, {pipeline_mode = #tpu.pipeline_mode<synchronous>, transform_indices = @transform_3, window_bounds = array<i64: 32, 64>}, {pipeline_mode = #tpu.pipeline_mode<synchronous>, transform_indices = @transform_4, window_bounds = array<i64: 1, 64>}, {pipeline_mode = #tpu.pipeline_mode<synchronous>, transform_indices = @transform_5, window_bounds = array<i64: 32, 32>}, {pipeline_mode = #tpu.pipeline_mode<synchronous>, transform_indices = @transform_6, window_bounds = array<i64: 1, 32>}, {pipeline_mode = #tpu.pipeline_mode<synchronous>, transform_indices = @transform_7, window_bounds = array<i64: 32, 32>}, {pipeline_mode = #tpu.pipeline_mode<synchronous>, transform_indices = @transform_8, window_bounds = array<i64: 1, 32>}, {pipeline_mode = #tpu.pipeline_mode<synchronous>, transform_indices = @transform_9, window_bounds = array<i64: 32, 64>}, {pipeline_mode = #tpu.pipeline_mode<synchronous>, transform_indices = @transform_10, window_bounds = array<i64: 1, 64>}, {pipeline_mode = #tpu.pipeline_mode<synchronous>, transform_indices = @transform_11, window_bounds = array<i64: 64, 32>}, {pipeline_mode = #tpu.pipeline_mode<synchronous>, transform_indices = @transform_12, window_bounds = array<i64: 1, 32>}, {pipeline_mode = #tpu.pipeline_mode<synchronous>, transform_indices = @transform_13, window_bounds = array<i64: 1, 32>}, {pipeline_mode = #tpu.pipeline_mode<synchronous>, transform_indices = @transform_14, window_bounds = array<i64: 1, 32>}, {pipeline_mode = #tpu.pipeline_mode<synchronous>, transform_indices = @transform_15, window_bounds = array<i64: 1, 32>}, {pipeline_mode = #tpu.pipeline_mode<synchronous>, transform_indices = @transform_16, window_bounds = array<i64: 1, 32>}, {transform_indices = @transform_17, window_bounds = array<i64: 1, 16, 32>}]} {
    %c0_i32 = arith.constant 0 : i32
    %0 = arith.cmpi eq, %arg1, %c0_i32 : i32
    %1 = arith.extui %0 : i1 to i32
    %c0_i32_0 = arith.constant 0 : i32
    %2 = arith.cmpi ne, %1, %c0_i32_0 : i32
    scf.if %2 {
      %c0_72 = arith.constant 0 : index
      %c0_73 = arith.constant 0 : index
      %c0_74 = arith.constant 0 : index
      %177 = vector.load %arg2[%c0_72, %c0_73, %c0_74] : memref<1x16x32xf32, #tpu.memory_space<vmem>>, vector<1x16x32xf32>
      %178 = vector.shape_cast %177 : vector<1x16x32xf32> to vector<16x32xf32>
      %c0_75 = arith.constant 0 : index
      %c0_76 = arith.constant 0 : index
      %c0_77 = arith.constant 0 : index
      %179 = vector.load %arg19[%c0_75, %c0_76, %c0_77] : memref<1x16x32xf32, #tpu.memory_space<vmem>>, vector<1x16x32xf32>
      %180 = vector.shape_cast %179 : vector<1x16x32xf32> to vector<16x32xf32>
      %181 = vector.shape_cast %178 : vector<16x32xf32> to vector<1x16x32xf32>
      tpu.vector_store %arg19[%c0_75, %c0_76, %c0_77], %181 {strides = array<i32>} : memref<1x16x32xf32, #tpu.memory_space<vmem>>, vector<1x16x32xf32>,
    } else {
    }
    %c0 = arith.constant 0 : index
    %c0_1 = arith.constant 0 : index
    %c0_2 = arith.constant 0 : index
    %3 = vector.load %arg19[%c0, %c0_1, %c0_2] : memref<1x16x32xf32, #tpu.memory_space<vmem>>, vector<1x16x32xf32>
    %4 = vector.shape_cast %3 : vector<1x16x32xf32> to vector<16x32xf32>
    %c0_3 = arith.constant 0 : index
    %c0_4 = arith.constant 0 : index
    %c0_5 = arith.constant 0 : index
    %5 = vector.load %arg3[%c0_3, %c0_4, %c0_5] : memref<1x16x32xf32, #tpu.memory_space<vmem>>, vector<1x16x32xf32>
    %6 = vector.shape_cast %5 : vector<1x16x32xf32> to vector<16x32xf32>
    %7 = arith.addf %4, %6 : vector<16x32xf32>
    %8 = arith.truncf %7 : vector<16x32xf32> to vector<16x32xbf16>
    %c0_6 = arith.constant 0 : index
    %c0_7 = arith.constant 0 : index
    %9 = vector.load %arg5[%c0_6, %c0_7] : memref<32x64xbf16, #tpu.memory_space<vmem>>, vector<32x64xbf16>
    %cst = arith.constant dense<0.000000e+00> : vector<16x64xf32>
    %10 = tpu.matmul %8, %9, %cst {dimension_numbers = #tpu.dot_dimension_numbers<[1], [0], [0], [1], [0, 0, 1, 1], [], []>} : vector<16x32xbf16>, vector<32x64xbf16>, vector<16x64xf32> -> vector<16x64xf32>
    %c0_8 = arith.constant 0 : index
    %c0_9 = arith.constant 0 : index
    %11 = vector.load %arg6[%c0_8, %c0_9] : memref<1x64xf32, #tpu.memory_space<vmem>>, vector<1x64xf32>
    %12 = vector.broadcast %11 : vector<1x64xf32> to vector<16x64xf32>
    %13 = arith.addf %10, %12 : vector<16x64xf32>
    %14 = arith.truncf %4 : vector<16x32xf32> to vector<16x32xbf16>
    %c0_10 = arith.constant 0 : index
    %c0_11 = arith.constant 0 : index
    %15 = vector.load %arg7[%c0_10, %c0_11] : memref<32x32xbf16, #tpu.memory_space<vmem>>, vector<32x32xbf16>
    %cst_12 = arith.constant dense<0.000000e+00> : vector<16x32xf32>
    %16 = tpu.matmul %14, %15, %cst_12 {dimension_numbers = #tpu.dot_dimension_numbers<[1], [0], [0], [1], [0, 0, 1, 1], [], []>} : vector<16x32xbf16>, vector<32x32xbf16>, vector<16x32xf32> -> vector<16x32xf32>
    %c0_13 = arith.constant 0 : index
    %c0_14 = arith.constant 0 : index
    %17 = vector.load %arg8[%c0_13, %c0_14] : memref<1x32xf32, #tpu.memory_space<vmem>>, vector<1x32xf32>
    %18 = vector.broadcast %17 : vector<1x32xf32> to vector<16x32xf32>
    %19 = arith.addf %16, %18 : vector<16x32xf32>
    %20 = vector.extract_strided_slice %13 {offsets = [0, 0], sizes = [16, 32], strides = [1, 1]} : vector<16x64xf32> to vector<16x32xf32>
    %21 = arith.truncf %20 : vector<16x32xf32> to vector<16x32xbf16>
    %22 = vector.extract_strided_slice %13 {offsets = [0, 32], sizes = [16, 32], strides = [1, 1]} : vector<16x64xf32> to vector<16x32xf32>
    %23 = arith.truncf %22 : vector<16x32xf32> to vector<16x32xbf16>
    %24 = arith.truncf %19 : vector<16x32xf32> to vector<16x32xbf16>
    %c0_15 = arith.constant 0 : index
    %c0_16 = arith.constant 0 : index
    %25 = vector.load %arg9[%c0_15, %c0_16] : memref<32x32xbf16, #tpu.memory_space<vmem>>, vector<32x32xbf16>
    %cst_17 = arith.constant 0.000000e+00 : f32
    %26 = vector.broadcast %cst_17 : f32 to vector<16x32xf32>
    %27 = vector.extract_strided_slice %21 {offsets = [0, 0], sizes = [16, 8], strides = [1, 1]} : vector<16x32xbf16> to vector<16x8xbf16>
    %28 = vector.extract_strided_slice %23 {offsets = [0, 0], sizes = [16, 8], strides = [1, 1]} : vector<16x32xbf16> to vector<16x8xbf16>
    %cst_18 = arith.constant dense<0.000000e+00> : vector<16x16xf32>
    %29 = tpu.matmul %27, %28, %cst_18 {dimension_numbers = #tpu.dot_dimension_numbers<[1], [1], [0], [0], [0, 0, 1, 0], [], []>} : vector<16x8xbf16>, vector<16x8xbf16>, vector<16x16xf32> -> vector<16x16xf32>
    %cst_19 = arith.constant dense<0xFF800000> : vector<16xf32>
    %30 = vector.multi_reduction <maximumf>, %29, %cst_19 [1] : vector<16x16xf32> to vector<16xf32>
    %31 = vector.shape_cast %30 : vector<16xf32> to vector<16x1xf32>
    %32 = vector.broadcast %31 : vector<16x1xf32> to vector<16x16xf32>
    %33 = arith.subf %29, %32 : vector<16x16xf32>
    %34 = math.exp %33 : vector<16x16xf32>
    %cst_20 = arith.constant dense<0.000000e+00> : vector<16xf32>
    %35 = vector.multi_reduction <add>, %34, %cst_20 [1] : vector<16x16xf32> to vector<16xf32>
    %36 = vector.shape_cast %35 : vector<16xf32> to vector<16x1xf32>
    %37 = tpu.reciprocal %36 {approx = true} : vector<16x1xf32> -> vector<16x1xf32>
    %38 = vector.broadcast %37 : vector<16x1xf32> to vector<16x16xf32>
    %39 = arith.mulf %34, %38 : vector<16x16xf32>
    %40 = arith.truncf %39 : vector<16x16xf32> to vector<16x16xbf16>
    %41 = vector.extract_strided_slice %24 {offsets = [0, 0], sizes = [16, 8], strides = [1, 1]} : vector<16x32xbf16> to vector<16x8xbf16>
    %cst_21 = arith.constant dense<0.000000e+00> : vector<16x8xf32>
    %42 = tpu.matmul %40, %41, %cst_21 {dimension_numbers = #tpu.dot_dimension_numbers<[1], [0], [0], [1], [0, 0, 1, 1], [], []>} : vector<16x16xbf16>, vector<16x8xbf16>, vector<16x8xf32> -> vector<16x8xf32>
    %43 = arith.truncf %42 : vector<16x8xf32> to vector<16x8xbf16>
    %44 = vector.extract_strided_slice %25 {offsets = [0, 0], sizes = [8, 32], strides = [1, 1]} : vector<32x32xbf16> to vector<8x32xbf16>
    %cst_22 = arith.constant dense<0.000000e+00> : vector<16x32xf32>
    %45 = tpu.matmul %43, %44, %cst_22 {dimension_numbers = #tpu.dot_dimension_numbers<[1], [0], [0], [1], [0, 0, 1, 1], [], []>} : vector<16x8xbf16>, vector<8x32xbf16>, vector<16x32xf32> -> vector<16x32xf32>
    %46 = arith.addf %26, %45 : vector<16x32xf32>
    %47 = vector.extract_strided_slice %21 {offsets = [0, 8], sizes = [16, 8], strides = [1, 1]} : vector<16x32xbf16> to vector<16x8xbf16>
    %48 = vector.extract_strided_slice %23 {offsets = [0, 8], sizes = [16, 8], strides = [1, 1]} : vector<16x32xbf16> to vector<16x8xbf16>
    %cst_23 = arith.constant dense<0.000000e+00> : vector<16x16xf32>
    %49 = tpu.matmul %47, %48, %cst_23 {dimension_numbers = #tpu.dot_dimension_numbers<[1], [1], [0], [0], [0, 0, 1, 0], [], []>} : vector<16x8xbf16>, vector<16x8xbf16>, vector<16x16xf32> -> vector<16x16xf32>
    %cst_24 = arith.constant dense<0xFF800000> : vector<16xf32>
    %50 = vector.multi_reduction <maximumf>, %49, %cst_24 [1] : vector<16x16xf32> to vector<16xf32>
    %51 = vector.shape_cast %50 : vector<16xf32> to vector<16x1xf32>
    %52 = vector.broadcast %51 : vector<16x1xf32> to vector<16x16xf32>
    %53 = arith.subf %49, %52 : vector<16x16xf32>
    %54 = math.exp %53 : vector<16x16xf32>
    %cst_25 = arith.constant dense<0.000000e+00> : vector<16xf32>
    %55 = vector.multi_reduction <add>, %54, %cst_25 [1] : vector<16x16xf32> to vector<16xf32>
    %56 = vector.shape_cast %55 : vector<16xf32> to vector<16x1xf32>
    %57 = tpu.reciprocal %56 {approx = true} : vector<16x1xf32> -> vector<16x1xf32>
    %58 = vector.broadcast %57 : vector<16x1xf32> to vector<16x16xf32>
    %59 = arith.mulf %54, %58 : vector<16x16xf32>
    %60 = arith.truncf %59 : vector<16x16xf32> to vector<16x16xbf16>
    %61 = vector.extract_strided_slice %24 {offsets = [0, 8], sizes = [16, 8], strides = [1, 1]} : vector<16x32xbf16> to vector<16x8xbf16>
    %cst_26 = arith.constant dense<0.000000e+00> : vector<16x8xf32>
    %62 = tpu.matmul %60, %61, %cst_26 {dimension_numbers = #tpu.dot_dimension_numbers<[1], [0], [0], [1], [0, 0, 1, 1], [], []>} : vector<16x16xbf16>, vector<16x8xbf16>, vector<16x8xf32> -> vector<16x8xf32>
    %63 = arith.truncf %62 : vector<16x8xf32> to vector<16x8xbf16>
    %64 = vector.extract_strided_slice %25 {offsets = [8, 0], sizes = [8, 32], strides = [1, 1]} : vector<32x32xbf16> to vector<8x32xbf16>
    %cst_27 = arith.constant dense<0.000000e+00> : vector<16x32xf32>
    %65 = tpu.matmul %63, %64, %cst_27 {dimension_numbers = #tpu.dot_dimension_numbers<[1], [0], [0], [1], [0, 0, 1, 1], [], []>} : vector<16x8xbf16>, vector<8x32xbf16>, vector<16x32xf32> -> vector<16x32xf32>
    %66 = arith.addf %46, %65 : vector<16x32xf32>
    %67 = vector.extract_strided_slice %21 {offsets = [0, 16], sizes = [16, 8], strides = [1, 1]} : vector<16x32xbf16> to vector<16x8xbf16>
    %68 = vector.extract_strided_slice %23 {offsets = [0, 16], sizes = [16, 8], strides = [1, 1]} : vector<16x32xbf16> to vector<16x8xbf16>
    %cst_28 = arith.constant dense<0.000000e+00> : vector<16x16xf32>
    %69 = tpu.matmul %67, %68, %cst_28 {dimension_numbers = #tpu.dot_dimension_numbers<[1], [1], [0], [0], [0, 0, 1, 0], [], []>} : vector<16x8xbf16>, vector<16x8xbf16>, vector<16x16xf32> -> vector<16x16xf32>
    %cst_29 = arith.constant dense<0xFF800000> : vector<16xf32>
    %70 = vector.multi_reduction <maximumf>, %69, %cst_29 [1] : vector<16x16xf32> to vector<16xf32>
    %71 = vector.shape_cast %70 : vector<16xf32> to vector<16x1xf32>
    %72 = vector.broadcast %71 : vector<16x1xf32> to vector<16x16xf32>
    %73 = arith.subf %69, %72 : vector<16x16xf32>
    %74 = math.exp %73 : vector<16x16xf32>
    %cst_30 = arith.constant dense<0.000000e+00> : vector<16xf32>
    %75 = vector.multi_reduction <add>, %74, %cst_30 [1] : vector<16x16xf32> to vector<16xf32>
    %76 = vector.shape_cast %75 : vector<16xf32> to vector<16x1xf32>
    %77 = tpu.reciprocal %76 {approx = true} : vector<16x1xf32> -> vector<16x1xf32>
    %78 = vector.broadcast %77 : vector<16x1xf32> to vector<16x16xf32>
    %79 = arith.mulf %74, %78 : vector<16x16xf32>
    %80 = arith.truncf %79 : vector<16x16xf32> to vector<16x16xbf16>
    %81 = vector.extract_strided_slice %24 {offsets = [0, 16], sizes = [16, 8], strides = [1, 1]} : vector<16x32xbf16> to vector<16x8xbf16>
    %cst_31 = arith.constant dense<0.000000e+00> : vector<16x8xf32>
    %82 = tpu.matmul %80, %81, %cst_31 {dimension_numbers = #tpu.dot_dimension_numbers<[1], [0], [0], [1], [0, 0, 1, 1], [], []>} : vector<16x16xbf16>, vector<16x8xbf16>, vector<16x8xf32> -> vector<16x8xf32>
    %83 = arith.truncf %82 : vector<16x8xf32> to vector<16x8xbf16>
    %84 = vector.extract_strided_slice %25 {offsets = [16, 0], sizes = [8, 32], strides = [1, 1]} : vector<32x32xbf16> to vector<8x32xbf16>
    %cst_32 = arith.constant dense<0.000000e+00> : vector<16x32xf32>
    %85 = tpu.matmul %83, %84, %cst_32 {dimension_numbers = #tpu.dot_dimension_numbers<[1], [0], [0], [1], [0, 0, 1, 1], [], []>} : vector<16x8xbf16>, vector<8x32xbf16>, vector<16x32xf32> -> vector<16x32xf32>
    %86 = arith.addf %66, %85 : vector<16x32xf32>
    %87 = vector.extract_strided_slice %21 {offsets = [0, 24], sizes = [16, 8], strides = [1, 1]} : vector<16x32xbf16> to vector<16x8xbf16>
    %88 = vector.extract_strided_slice %23 {offsets = [0, 24], sizes = [16, 8], strides = [1, 1]} : vector<16x32xbf16> to vector<16x8xbf16>
    %cst_33 = arith.constant dense<0.000000e+00> : vector<16x16xf32>
    %89 = tpu.matmul %87, %88, %cst_33 {dimension_numbers = #tpu.dot_dimension_numbers<[1], [1], [0], [0], [0, 0, 1, 0], [], []>} : vector<16x8xbf16>, vector<16x8xbf16>, vector<16x16xf32> -> vector<16x16xf32>
    %cst_34 = arith.constant dense<0xFF800000> : vector<16xf32>
    %90 = vector.multi_reduction <maximumf>, %89, %cst_34 [1] : vector<16x16xf32> to vector<16xf32>
    %91 = vector.shape_cast %90 : vector<16xf32> to vector<16x1xf32>
    %92 = vector.broadcast %91 : vector<16x1xf32> to vector<16x16xf32>
    %93 = arith.subf %89, %92 : vector<16x16xf32>
    %94 = math.exp %93 : vector<16x16xf32>
    %cst_35 = arith.constant dense<0.000000e+00> : vector<16xf32>
    %95 = vector.multi_reduction <add>, %94, %cst_35 [1] : vector<16x16xf32> to vector<16xf32>
    %96 = vector.shape_cast %95 : vector<16xf32> to vector<16x1xf32>
    %97 = tpu.reciprocal %96 {approx = true} : vector<16x1xf32> -> vector<16x1xf32>
    %98 = vector.broadcast %97 : vector<16x1xf32> to vector<16x16xf32>
    %99 = arith.mulf %94, %98 : vector<16x16xf32>
    %100 = arith.truncf %99 : vector<16x16xf32> to vector<16x16xbf16>
    %101 = vector.extract_strided_slice %24 {offsets = [0, 24], sizes = [16, 8], strides = [1, 1]} : vector<16x32xbf16> to vector<16x8xbf16>
    %cst_36 = arith.constant dense<0.000000e+00> : vector<16x8xf32>
    %102 = tpu.matmul %100, %101, %cst_36 {dimension_numbers = #tpu.dot_dimension_numbers<[1], [0], [0], [1], [0, 0, 1, 1], [], []>} : vector<16x16xbf16>, vector<16x8xbf16>, vector<16x8xf32> -> vector<16x8xf32>
    %103 = arith.truncf %102 : vector<16x8xf32> to vector<16x8xbf16>
    %104 = vector.extract_strided_slice %25 {offsets = [24, 0], sizes = [8, 32], strides = [1, 1]} : vector<32x32xbf16> to vector<8x32xbf16>
    %cst_37 = arith.constant dense<0.000000e+00> : vector<16x32xf32>
    %105 = tpu.matmul %103, %104, %cst_37 {dimension_numbers = #tpu.dot_dimension_numbers<[1], [0], [0], [1], [0, 0, 1, 1], [], []>} : vector<16x8xbf16>, vector<8x32xbf16>, vector<16x32xf32> -> vector<16x32xf32>
    %106 = arith.addf %86, %105 : vector<16x32xf32>
    %c0_38 = arith.constant 0 : index
    %c0_39 = arith.constant 0 : index
    %107 = vector.load %arg10[%c0_38, %c0_39] : memref<1x32xf32, #tpu.memory_space<vmem>>, vector<1x32xf32>
    %108 = vector.broadcast %107 : vector<1x32xf32> to vector<16x32xf32>
    %109 = arith.addf %106, %108 : vector<16x32xf32>
    %110 = arith.addf %4, %109 : vector<16x32xf32>
    %c0_40 = arith.constant 0 : index
    %c0_41 = arith.constant 0 : index
    %111 = vector.load %arg15[%c0_40, %c0_41] : memref<1x32xf32, #tpu.memory_space<vmem>>, vector<1x32xf32>
    %c0_42 = arith.constant 0 : index
    %c0_43 = arith.constant 0 : index
    %112 = vector.load %arg16[%c0_42, %c0_43] : memref<1x32xf32, #tpu.memory_space<vmem>>, vector<1x32xf32>
    %cst_44 = arith.constant dense<0.000000e+00> : vector<16xf32>
    %113 = vector.multi_reduction <add>, %110, %cst_44 [1] : vector<16x32xf32> to vector<16xf32>
    %114 = vector.shape_cast %113 : vector<16xf32> to vector<16x1xf32>
    %cst_45 = arith.constant 3.200000e+01 : f32
    %115 = vector.broadcast %cst_45 : f32 to vector<16x1xf32>
    %116 = arith.divf %114, %115 : vector<16x1xf32>
    %117 = vector.broadcast %116 : vector<16x1xf32> to vector<16x32xf32>
    %118 = arith.subf %110, %117 : vector<16x32xf32>
    %119 = arith.mulf %118, %118 : vector<16x32xf32>
    %cst_46 = arith.constant dense<0.000000e+00> : vector<16xf32>
    %120 = vector.multi_reduction <add>, %119, %cst_46 [1] : vector<16x32xf32> to vector<16xf32>
    %121 = vector.shape_cast %120 : vector<16xf32> to vector<16x1xf32>
    %cst_47 = arith.constant 3.200000e+01 : f32
    %122 = vector.broadcast %cst_47 : f32 to vector<16x1xf32>
    %123 = arith.divf %121, %122 : vector<16x1xf32>
    %124 = vector.broadcast %116 : vector<16x1xf32> to vector<16x32xf32>
    %125 = arith.subf %110, %124 : vector<16x32xf32>
    %cst_48 = arith.constant 9.99999974E-6 : f32
    %126 = vector.broadcast %cst_48 : f32 to vector<16x1xf32>
    %127 = arith.addf %123, %126 : vector<16x1xf32>
    %128 = math.rsqrt %127 : vector<16x1xf32>
    %129 = vector.broadcast %128 : vector<16x1xf32> to vector<16x32xf32>
    %130 = arith.mulf %125, %129 : vector<16x32xf32>
    %131 = vector.broadcast %111 : vector<1x32xf32> to vector<16x32xf32>
    %132 = arith.mulf %130, %131 : vector<16x32xf32>
    %133 = vector.broadcast %112 : vector<1x32xf32> to vector<16x32xf32>
    %134 = arith.addf %132, %133 : vector<16x32xf32>
    %135 = arith.truncf %134 : vector<16x32xf32> to vector<16x32xbf16>
    %c0_49 = arith.constant 0 : index
    %c0_50 = arith.constant 0 : index
    %136 = vector.load %arg11[%c0_49, %c0_50] : memref<32x64xbf16, #tpu.memory_space<vmem>>, vector<32x64xbf16>
    %cst_51 = arith.constant dense<0.000000e+00> : vector<16x64xf32>
    %137 = tpu.matmul %135, %136, %cst_51 {dimension_numbers = #tpu.dot_dimension_numbers<[1], [0], [0], [1], [0, 0, 1, 1], [], []>} : vector<16x32xbf16>, vector<32x64xbf16>, vector<16x64xf32> -> vector<16x64xf32>
    %c0_52 = arith.constant 0 : index
    %c0_53 = arith.constant 0 : index
    %138 = vector.load %arg12[%c0_52, %c0_53] : memref<1x64xf32, #tpu.memory_space<vmem>>, vector<1x64xf32>
    %139 = vector.broadcast %138 : vector<1x64xf32> to vector<16x64xf32>
    %140 = arith.addf %137, %139 : vector<16x64xf32>
    %cst_54 = arith.constant 0.000000e+00 : f32
    %141 = vector.broadcast %cst_54 : f32 to vector<16x64xf32>
    %142 = arith.maximumf %140, %141 : vector<16x64xf32>
    %143 = arith.truncf %142 : vector<16x64xf32> to vector<16x64xbf16>
    %c0_55 = arith.constant 0 : index
    %c0_56 = arith.constant 0 : index
    %144 = vector.load %arg13[%c0_55, %c0_56] : memref<64x32xbf16, #tpu.memory_space<vmem>>, vector<64x32xbf16>
    %cst_57 = arith.constant dense<0.000000e+00> : vector<16x32xf32>
    %145 = tpu.matmul %143, %144, %cst_57 {dimension_numbers = #tpu.dot_dimension_numbers<[1], [0], [0], [1], [0, 0, 1, 1], [], []>} : vector<16x64xbf16>, vector<64x32xbf16>, vector<16x32xf32> -> vector<16x32xf32>
    %c0_58 = arith.constant 0 : index
    %c0_59 = arith.constant 0 : index
    %146 = vector.load %arg14[%c0_58, %c0_59] : memref<1x32xf32, #tpu.memory_space<vmem>>, vector<1x32xf32>
    %147 = vector.broadcast %146 : vector<1x32xf32> to vector<16x32xf32>
    %148 = arith.addf %145, %147 : vector<16x32xf32>
    %149 = arith.addf %134, %148 : vector<16x32xf32>
    %c0_60 = arith.constant 0 : index
    %c0_61 = arith.constant 0 : index
    %150 = vector.load %arg17[%c0_60, %c0_61] : memref<1x32xf32, #tpu.memory_space<vmem>>, vector<1x32xf32>
    %c0_62 = arith.constant 0 : index
    %c0_63 = arith.constant 0 : index
    %151 = vector.load %arg18[%c0_62, %c0_63] : memref<1x32xf32, #tpu.memory_space<vmem>>, vector<1x32xf32>
    %cst_64 = arith.constant dense<0.000000e+00> : vector<16xf32>
    %152 = vector.multi_reduction <add>, %149, %cst_64 [1] : vector<16x32xf32> to vector<16xf32>
    %153 = vector.shape_cast %152 : vector<16xf32> to vector<16x1xf32>
    %cst_65 = arith.constant 3.200000e+01 : f32
    %154 = vector.broadcast %cst_65 : f32 to vector<16x1xf32>
    %155 = arith.divf %153, %154 : vector<16x1xf32>
    %156 = vector.broadcast %155 : vector<16x1xf32> to vector<16x32xf32>
    %157 = arith.subf %149, %156 : vector<16x32xf32>
    %158 = arith.mulf %157, %157 : vector<16x32xf32>
    %cst_66 = arith.constant dense<0.000000e+00> : vector<16xf32>
    %159 = vector.multi_reduction <add>, %158, %cst_66 [1] : vector<16x32xf32> to vector<16xf32>
    %160 = vector.shape_cast %159 : vector<16xf32> to vector<16x1xf32>
    %cst_67 = arith.constant 3.200000e+01 : f32
    %161 = vector.broadcast %cst_67 : f32 to vector<16x1xf32>
    %162 = arith.divf %160, %161 : vector<16x1xf32>
    %163 = vector.broadcast %155 : vector<16x1xf32> to vector<16x32xf32>
    %164 = arith.subf %149, %163 : vector<16x32xf32>
    %cst_68 = arith.constant 9.99999974E-6 : f32
    %165 = vector.broadcast %cst_68 : f32 to vector<16x1xf32>
    %166 = arith.addf %162, %165 : vector<16x1xf32>
    %167 = math.rsqrt %166 : vector<16x1xf32>
    %168 = vector.broadcast %167 : vector<16x1xf32> to vector<16x32xf32>
    %169 = arith.mulf %164, %168 : vector<16x32xf32>
    %170 = vector.broadcast %150 : vector<1x32xf32> to vector<16x32xf32>
    %171 = arith.mulf %169, %170 : vector<16x32xf32>
    %172 = vector.broadcast %151 : vector<1x32xf32> to vector<16x32xf32>
    %173 = arith.addf %171, %172 : vector<16x32xf32>
    %c0_69 = arith.constant 0 : index
    %c0_70 = arith.constant 0 : index
    %c0_71 = arith.constant 0 : index
    %174 = vector.load %arg19[%c0_69, %c0_70, %c0_71] : memref<1x16x32xf32, #tpu.memory_space<vmem>>, vector<1x16x32xf32>
    %175 = vector.shape_cast %174 : vector<1x16x32xf32> to vector<16x32xf32>
    %176 = vector.shape_cast %173 : vector<16x32xf32> to vector<1x16x32xf32>
    tpu.vector_store %arg19[%c0_69, %c0_70, %c0_71], %176 {strides = array<i32>} : memref<1x16x32xf32, #tpu.memory_space<vmem>>, vector<1x16x32xf32>,
    return
  }
  func.func @transform_0(%arg0: i32, %arg1: i32) -> (i32, i32, i32) {
    %c0_i32 = arith.constant 0 : i32
    %c0_i32_0 = arith.constant 0 : i32
    %c0_i32_1 = arith.constant 0 : i32
    return %arg0, %c0_i32, %c0_i32_0 : i32, i32, i32
  }
  func.func @transform_1(%arg0: i32, %arg1: i32) -> (i32, i32, i32) {
    %c0_i32 = arith.constant 0 : i32
    %c0_i32_0 = arith.constant 0 : i32
    %c0_i32_1 = arith.constant 0 : i32
    return %arg0, %c0_i32, %c0_i32_0 : i32, i32, i32
  }
  func.func @transform_2(%arg0: i32, %arg1: i32) -> (i32, i32, i32) {
    %c0_i32 = arith.constant 0 : i32
    %c0_i32_0 = arith.constant 0 : i32
    %c0_i32_1 = arith.constant 0 : i32
    return %arg0, %c0_i32, %c0_i32_0 : i32, i32, i32
  }
  func.func @transform_3(%arg0: i32, %arg1: i32) -> (i32, i32) {
    %c0_i32 = arith.constant 0 : i32
    %c0_i32_0 = arith.constant 0 : i32
    %c0_i32_1 = arith.constant 0 : i32
    return %c0_i32, %c0_i32_0 : i32, i32
  }
  func.func @transform_4(%arg0: i32, %arg1: i32) -> (i32, i32) {
    %c0_i32 = arith.constant 0 : i32
    %c0_i32_0 = arith.constant 0 : i32
    %c0_i32_1 = arith.constant 0 : i32
    return %c0_i32, %c0_i32_0 : i32, i32
  }
  func.func @transform_5(%arg0: i32, %arg1: i32) -> (i32, i32) {
    %c0_i32 = arith.constant 0 : i32
    %c0_i32_0 = arith.constant 0 : i32
    %c0_i32_1 = arith.constant 0 : i32
    return %c0_i32, %c0_i32_0 : i32, i32
  }
  func.func @transform_6(%arg0: i32, %arg1: i32) -> (i32, i32) {
    %c0_i32 = arith.constant 0 : i32
    %c0_i32_0 = arith.constant 0 : i32
    %c0_i32_1 = arith.constant 0 : i32
    return %c0_i32, %c0_i32_0 : i32, i32
  }
  func.func @transform_7(%arg0: i32, %arg1: i32) -> (i32, i32) {
    %c0_i32 = arith.constant 0 : i32
    %c0_i32_0 = arith.constant 0 : i32
    %c0_i32_1 = arith.constant 0 : i32
    return %c0_i32, %c0_i32_0 : i32, i32
  }
  func.func @transform_8(%arg0: i32, %arg1: i32) -> (i32, i32) {
    %c0_i32 = arith.constant 0 : i32
    %c0_i32_0 = arith.constant 0 : i32
    %c0_i32_1 = arith.constant 0 : i32
    return %c0_i32, %c0_i32_0 : i32, i32
  }
  func.func @transform_9(%arg0: i32, %arg1: i32) -> (i32, i32) {
    %c0_i32 = arith.constant 0 : i32
    %c0_i32_0 = arith.constant 0 : i32
    %c0_i32_1 = arith.constant 0 : i32
    return %c0_i32, %c0_i32_0 : i32, i32
  }
  func.func @transform_10(%arg0: i32, %arg1: i32) -> (i32, i32) {
    %c0_i32 = arith.constant 0 : i32
    %c0_i32_0 = arith.constant 0 : i32
    %c0_i32_1 = arith.constant 0 : i32
    return %c0_i32, %c0_i32_0 : i32, i32
  }
  func.func @transform_11(%arg0: i32, %arg1: i32) -> (i32, i32) {
    %c0_i32 = arith.constant 0 : i32
    %c0_i32_0 = arith.constant 0 : i32
    %c0_i32_1 = arith.constant 0 : i32
    return %c0_i32, %c0_i32_0 : i32, i32
  }
  func.func @transform_12(%arg0: i32, %arg1: i32) -> (i32, i32) {
    %c0_i32 = arith.constant 0 : i32
    %c0_i32_0 = arith.constant 0 : i32
    %c0_i32_1 = arith.constant 0 : i32
    return %c0_i32, %c0_i32_0 : i32, i32
  }
  func.func @transform_13(%arg0: i32, %arg1: i32) -> (i32, i32) {
    %c0_i32 = arith.constant 0 : i32
    %c0_i32_0 = arith.constant 0 : i32
    %c0_i32_1 = arith.constant 0 : i32
    return %c0_i32, %c0_i32_0 : i32, i32
  }
  func.func @transform_14(%arg0: i32, %arg1: i32) -> (i32, i32) {
    %c0_i32 = arith.constant 0 : i32
    %c0_i32_0 = arith.constant 0 : i32
    %c0_i32_1 = arith.constant 0 : i32
    return %c0_i32, %c0_i32_0 : i32, i32
  }
  func.func @transform_15(%arg0: i32, %arg1: i32) -> (i32, i32) {
    %c0_i32 = arith.constant 0 : i32
    %c0_i32_0 = arith.constant 0 : i32
    %c0_i32_1 = arith.constant 0 : i32
    return %c0_i32, %c0_i32_0 : i32, i32
  }
  func.func @transform_16(%arg0: i32, %arg1: i32) -> (i32, i32) {
    %c0_i32 = arith.constant 0 : i32
    %c0_i32_0 = arith.constant 0 : i32
    %c0_i32_1 = arith.constant 0 : i32
    return %c0_i32, %c0_i32_0 : i32, i32
  }
  func.func @transform_17(%arg0: i32, %arg1: i32) -> (i32, i32, i32) {
    %c0_i32 = arith.constant 0 : i32
    %c0_i32_0 = arith.constant 0 : i32
    %c0_i32_1 = arith.constant 0 : i32
    return %arg0, %c0_i32, %c0_i32_0 : i32, i32, i32
  }
}

</mosaic_0001>

<bundles_post_ra>
// kernel: tpu_custom_call.1
= control target key start
LH: loop header
LB: loop body
LE: loop exit
PB: predicated region body
PF: predicated region fallthrough
CT: control target
= control target key end

     0   :  { %s3266_s0 = inlined_call_operand.vmem [shape: f32[2,16,32], index: 0, kind: input, shape index: {}]   ;;  %s3267_s1 = inlined_call_operand.hbm [shape: f32[2,16,32], index: 1, kind: input, shape index: {}]   ;;  %s3268_s2 = inlined_call_operand.hbm [shape: f32[2,1,16], index: 2, kind: input, shape index: {}]   ;;  %s3269_s3 = inlined_call_operand.vmem [shape: bf16[32,64], index: 3, kind: input, shape index: {}]   ;;  %s3270_s4 = inlined_call_operand.hbm [shape: f32[1,64], index: 4, kind: input, shape index: {}]   ;;  %s3271_s5 = inlined_call_operand.hbm [shape: bf16[32,32], index: 5, kind: input, shape index: {}]   ;;  %s3272_s6 = inlined_call_operand.hbm [shape: f32[1,32], index: 6, kind: input, shape index: {}]   ;;  %s3273_s7 = inlined_call_operand.hbm [shape: bf16[32,32], index: 7, kind: input, shape index: {}]   ;;  %s3274_s8 = inlined_call_operand.hbm [shape: f32[1,32], index: 8, kind: input, shape index: {}]   ;;  %s3275_s9 = inlined_call_operand.vmem [shape: bf16[32,64], index: 9, kind: input, shape index: {}]   ;;  %s3276_s10 = inlined_call_operand.vmem [shape: f32[1,64], index: 10, kind: input, shape index: {}]   ;;  %s3277_s11 = inlined_call_operand.vmem [shape: bf16[64,32], index: 11, kind: input, shape index: {}]   ;;  %s3278_s12 = inlined_call_operand.vmem [shape: f32[1,32], index: 12, kind: input, shape index: {}]   ;;  %s3279_s13 = inlined_call_operand.vmem [shape: f32[1,32], index: 13, kind: input, shape index: {}]   ;;  %s3280_s14 = inlined_call_operand.vmem [shape: f32[1,32], index: 14, kind: input, shape index: {}]   ;;  %s3281_s15 = inlined_call_operand.vmem [shape: f32[1,32], index: 15, kind: input, shape index: {}]   ;;  %s3282_s16 = inlined_call_operand.vmem [shape: f32[1,32], index: 16, kind: input, shape index: {}]   ;;  %s3283_s17 = inlined_call_operand.hbm [shape: f32[2,16,32], index: 17, kind: output, shape index: {}]  }
   0x1   :  { %3295 = sst [smem:[#allocation30_spill]] %s3266_s0 }
   0x2   :  { %3296 = sst [smem:[#allocation31_spill]] %s3267_s1 }
   0x3   :  { %3297 = sst [smem:[#allocation32_spill]] %s3270_s4 }
   0x4   :  { %3298 = sst [smem:[#allocation33_spill]] %s3271_s5 }
   0x5   :  { %3299 = sst [smem:[#allocation34_spill]] %s3272_s6 }
   0x6   :  { %3300 = sst [smem:[#allocation35_spill]] %s3273_s7 }
   0x7   :  { %3301 = sst [smem:[#allocation36_spill]] %s3274_s8 }
   0x8   :  { %3302 = sst [smem:[#allocation37_spill]] %s3276_s10 }
   0x9   :  { %3303 = sst [smem:[#allocation38_spill]] %s3278_s12 }
   0xa   :  { %3304 = sst [smem:[#allocation39_spill]] %s3280_s14 }
   0xb   :  { %3305 = sst [smem:[#allocation40_spill]] %s3281_s15 }
   0xc   :  { %3306 = sst [smem:[#allocation41_spill]] %s3282_s16 }
   0xd   :  { %3307 = sst [smem:[#allocation42_spill]] %s3283_s17 }
   0xe   :  { %22 = vsyncpa [#allocation3], 0 }
   0xf   :  { %24 = vsyncpa [#allocation3 + $0x1], 0 }
  0x10   :  { %25 = vsyncpa [#allocation6], 0 }
  0x11   :  { %27 = vsyncpa [#allocation6 + $0x1], 0 }
  0x12   :  { %28 = vsyncpa [#allocation9], 0 }
  0x13   :  { %29 = vsyncpa [#allocation12], 0 }
  0x14   :  { %30 = vsyncpa [#allocation4], 0 }
  0x15   :  { %32 = vsyncpa [#allocation4 + $0x1], 0  ;;  %s2799_s24 = smov 0   ;;  %s2801_s25 = smov 0  }
  0x16   :  { %s2803_s26 = smov 0   ;;  %s2805_s27 = smov 0  }
  0x17   :  { %s2807_s28 = smov 0   ;;  %s2809_s29 = smov 0  }
  0x18   :  { %s2811_s0 = smov 0   ;;  %s2813_s30 = smov 0  }
  0x19 LB: > { %3308 = sst [smem:[#allocation21_spill]] %s2656_s24  ;;  %s2840_s18 = sadd.s32 4294967295, %s2684_s30   ;;  %s2684_s30 = sphi %s2813_s30, %s38_s30   ;;  %s2680_s0 = sphi %s2811_s0, %s3358_s0   ;;  %s2676_s29 = sphi %s2809_s29, %s3352_s29   ;;  %s2672_s28 = sphi %s2807_s28, %s3357_s28   ;;  %s2668_s27 = sphi %s2805_s27, %s3356_s27   ;;  %s2664_s26 = sphi %s2803_s26, %s3350_s26   ;;  %s2660_s25 = sphi %s2801_s25, %s3355_s25   ;;  %s2656_s24 = sphi %s2799_s24, %s3354_s24  }
  0x1a   : > { %3309 = sst [smem:[#allocation22_spill]] %s2664_s26  ;;  %p1976_p0 = scmp.ge.s32.totalorder %s2684_s30, 1 }
  0x1b   : > { %3310 = sst [smem:[#allocation23_spill]] %s2676_s29  ;;  %p3285_p1 = scmp.eq.s32.totalorder %s2840_s18, 0 }
  0x1c   : > { %3311 = sst [smem:[#allocation24_spill]] %s2684_s30  ;;  %p453_p2 = scmp.lt.s32.totalorder %s2684_s30, 5 }
  0x1d   : > { %s2686_s1 = smov [#allocation7]   ;;  %s2687_s21 = smov [#allocation8]  }
  0x1e   : > { %p2845_p3 = pnand %p1976_p0, %p453_p2  ;;  %s469_s20 = sshll.u32 %s2686_s1, 4  ;;  %s470_s20 = int_to_ptr.vmem [resolvable:$true] %s469_s20 }
  0x1f   : > { %s479_s22 = sshll.u32 %s2687_s21, 4  ;;  %s2688_s17 = smov [#allocation11]   ;;  %s2857_s22 = int_to_ptr.vmem [resolvable:$true] %s479_s22 }
  0x20   : > { %p2213_p4 = pneg %p2845_p3  ;;  %s503_s16 = sshll.u32 %s2688_s17, 4  ;;  %s504_s16 = int_to_ptr.vmem [resolvable:$true] %s503_s16 }
  0x21   : > { %s2397_s1 = scalar_lea.vmem %s470_s20, 16  ;;  %s2404_s21 = scalar_lea.vmem %s470_s20, 32 }
  0x22   : > { %p2853_p5 = pnand %p2213_p4, %p3285_p1  ;;  %p2398_p7 = scmp.ne.s32.totalorder %s470_s20, %s2397_s1 }
  0x23   : > { %p2405_p10 = scmp.lt.s32.totalorder %s470_s20, %s470_s20  ;;  %p2406_p11 = scmp.lt.s32.totalorder %s2404_s21, %s2397_s1 }
  0x24   : > { %p2861_p6 = pneg %p2853_p5 }
  0x25   : > { %p2407_p12 = por %p2406_p11, %p2405_p10 }
  0x26   : > { %p2400_p8 = pnand %p2398_p7, %p2861_p6 }
  0x28   : > { %p2401_p9 = pneg %p2400_p8 }
  0x2a   : > { %p2408_p13 = pnand %p2407_p12, %p2401_p9 }
  0x2c   : > { %2411 = shalt.err (!%p2408_p13)
}
  0x2d   : > { %s3315_s4 = sld [smem:[#allocation32_spill]]  ;;  %s2423_s10 = scalar_lea.vmem %s2857_s22, 256 }
  0x2e   : > { %p2424_p0 = scmp.ne.s32.totalorder %s2857_s22, %s2423_s10  ;;  %p2431_p7 = scmp.lt.s32.totalorder %s2857_s22, %s2857_s22 }
  0x2f   : > { %p2432_p8 = scmp.lt.s32.totalorder %s2423_s10, %s2423_s10 }
  0x30   : > { %p2426_p2 = pnand %p2424_p0, %p2861_p6 }
  0x31   : > { %p2433_p9 = por %p2432_p8, %p2431_p7 }
  0x32   : > { %p2427_p4 = pneg %p2426_p2 }
  0x33   : > { %2216 = dma.hbm_to_vmem [thread:$0]  (!%p2853_p5), %s3315_s4, 16, %s470_s20, [#allocation6]  }
  0x34   : > { %p2434_p10 = pnand %p2433_p9, %p2427_p4 }
  0x36   : > { %2437 = shalt.err (!%p2434_p10)
}
  0x37   : > { %s2689_s1 = smov 64   ;;  %s2690_s12 = smov 4  }
  0x38   : > { %s3316_s5 = sld [smem:[#allocation33_spill]]  ;;  %s2449_s20 = scalar_lea.vmem %s504_s16, 256 }
  0x39   : > { %p2450_p11 = scmp.ne.s32.totalorder %s504_s16, %s2449_s20  ;;  %p2457_p0 = scmp.lt.s32.totalorder %s504_s16, %s504_s16 }
  0x3a   : > { %p2458_p2 = scmp.lt.s32.totalorder %s2449_s20, %s2449_s20 }
  0x3b   : > { %p2452_p12 = pnand %p2450_p11, %p2861_p6 }
  0x3c   : > { %p2459_p4 = por %p2458_p2, %p2457_p0 }
  0x3d   : > { %p2453_p13 = pneg %p2452_p12 }
  0x3e   : > { %2219 = dma.hbm_to_vmem [thread:$0]  (!%p2853_p5), %s3316_s5, 256, %s2857_s22, [#allocation9], %s2689_s1, %s2689_s1, %s2690_s12  }
  0x3f   : > { %p2460_p7 = pnand %p2459_p4, %p2453_p13 }
  0x41   : > { %2463 = shalt.err (!%p2460_p7)
}
  0x42   : > { %s3317_s7 = sld [smem:[#allocation35_spill]]  ;;  %s2691_s21 = smov [#allocation10]  }
  0x43   : > { %s493_s22 = sshll.u32 %s2691_s21, 4  ;;  %s2692_s17 = smov [#allocation13]   ;;  %s494_s22 = int_to_ptr.vmem [resolvable:$true] %s493_s22 }
  0x44   : > { %s517_s5 = sshll.u32 %s2692_s17, 4  ;;  %s2475_s14 = scalar_lea.vmem %s494_s22, 16  ;;  %s518_s5 = int_to_ptr.vmem [resolvable:$true] %s517_s5 }
  0x45   : > { %p2476_p8 = scmp.ne.s32.totalorder %s494_s22, %s2475_s14  ;;  %s2482_s20 = scalar_lea.vmem %s494_s22, 32 }
  0x46   : > { %p2483_p11 = scmp.lt.s32.totalorder %s494_s22, %s494_s22  ;;  %p2484_p12 = scmp.lt.s32.totalorder %s2482_s20, %s2475_s14 }
  0x47   : > { %p2478_p9 = pnand %p2476_p8, %p2861_p6 }
  0x48   : > { %2225 = dma.hbm_to_vmem [thread:$0]  (!%p2853_p5), %s3317_s7, 256, %s504_s16, [#allocation12], %s2689_s1, %s2689_s1, %s2690_s12  }
  0x49   : > { %p2479_p10 = pneg %p2478_p9  ;;  %p2485_p13 = por %p2484_p12, %p2483_p11 }
  0x4b   : > { %p2486_p0 = pnand %p2485_p13, %p2479_p10 }
  0x4d   : > { %2489 = shalt.err (!%p2486_p0)
}
  0x4e   : > { %s3318_s6 = sld [smem:[#allocation34_spill]]  ;;  %s2501_s1 = scalar_lea.vmem %s518_s5, 16 }
  0x4f   : > { %p2502_p2 = scmp.ne.s32.totalorder %s518_s5, %s2501_s1  ;;  %s2508_s12 = scalar_lea.vmem %s518_s5, 32 }
  0x50   : > { %p2509_p8 = scmp.lt.s32.totalorder %s518_s5, %s518_s5  ;;  %p2510_p9 = scmp.lt.s32.totalorder %s2508_s12, %s2501_s1 }
  0x51   : > { %p2504_p4 = pnand %p2502_p2, %p2861_p6 }
  0x52   : > { %p2511_p1 = por %p2510_p9, %p2509_p8 }
  0x53   : > { %p2505_p7 = pneg %p2504_p4 }
  0x54   : > { %2222 = dma.hbm_to_vmem [thread:$0]  (!%p2853_p5), %s3318_s6, 16, %s494_s22, [#allocation9]  }
  0x55   : > { %p2512_p11 = pnand %p2511_p1, %p2505_p7 }
  0x57   : > { %2515 = shalt.err (!%p2512_p11)
}
  0x58   : > { %s3319_s8 = sld [smem:[#allocation36_spill]]  ;;  %s1975_s15 = sadd.s32 4294967294, %s2684_s30  }
  0x59   : > { %s47_s21 = sadd.s32 1, %s2676_s29  ;;  %s50_s22 = sadd.s32 1, %s2680_s0 }
  0x5a   : > { %p48_p1 = scmp.ge.s32.totalorder %s47_s21, 2  ;;  %s83_s23 = sadd.s32 1, %s2664_s26 }
  0x5b   : > { %p90_p6 = scmp.ne.s32.totalorder %s2664_s26, %s2660_s25  ;;  %p91_p10 = scmp.eq.s32.totalorder %s2684_s30, 0 }
  0x5c   : > { %s3360_s21 = smov (%p48_p1, %s47_s21), 0  ;;  %s3362_s22 = smov (!%p48_p1, %s50_s22), %s2680_s0 }
  0x5d   : > { %3320 = sst [smem:[#allocation25_spill]] %s3360_s21  ;;  %p2915_p12 = por %p91_p10, %p90_p6 }
  0x5e   : > { %2228 = dma.hbm_to_vmem [thread:$0]  (!%p2853_p5), %s3319_s8, 16, %s518_s5, [#allocation12]  }
  0x5f   : > { %p96_p5 = scmp.ne.s32.totalorder %s2660_s25, %s2656_s24  ;;  %p52_p13 = scmp.ge.s32.totalorder %s3362_s22, 2 }
  0x60   : > { %p440_p0 = scmp.eq.s32.totalorder %s2840_s18, 3  ;;  %p3322_p2 = scmp.eq.s32.totalorder %s2840_s18, 0 }
  0x61   : > { %p446_p7 = scmp.eq.s32.totalorder %s1975_s15, 3  ;;  %s3364_s22 = smov (%p52_p13, %s3362_s22), 0 }
  0x62   : > { %p2924_p4 = por %p3322_p2, %p96_p5  ;;  %3324 = sst [smem:[#allocation26_spill]] %s3364_s22 }
  0x63   : > { %p2930_p8 = por %p440_p0, %p90_p6  ;;  %p2934_p9 = por %p446_p7, %p96_p5 }
  0x64   : > { %s80_s16 = ssub.s32 %s2680_s0, %s3364_s22  ;;  %p2245_p11 = scmp.lt.s32.totalorder %s2684_s30, 4 }
  0x65   : > { %s3325_s20 = scalar_select %p2930_p8, 1, 0 }
  0x66   : > { %s3327_s4 = scalar_select %p2934_p9, 1, 0 }
  0x67   : > { %3326 = sst [smem:[#allocation27_spill]] %s3325_s20  ;;  %p81_p1 = scmp.eq.s32.totalorder %s80_s16, 0 }
  0x68   : > { %3328 = sst [smem:[#allocation28_spill]] %s3327_s4  ;;  %s2942_s1 = sand.u32 1, %s2664_s26  }
  0x69   : > { %s1983_s12 = sshll.u32 %s2942_s1, 4  ;;  %s2038_s10 = sshll.u32 %s2680_s0, 8 }
  0x6a   : > { %s2946_s14 = scalar_select %p81_p1, %s2664_s26, %s83_s23  }
  0x6b   : > { %s3330_s7 = sld [smem:[#allocation31_spill]]  ;;  %s564_s21 = scalar_lea.vmem [#allocation2], %s1983_s12 }
  0x6c   : > { %3329 = sst [smem:[#allocation29_spill]] %s2946_s14  ;;  %s571_s29 = sshll.u32 %s564_s21, 4  ;;  %s572_s29 = int_to_ptr.vmem [resolvable:$true] %s571_s29 }
  0x6d   : > { %p2954_p6 = pnand %p2245_p11, %p2915_p12  ;;  %s581_s16 = sand.u32 1, %s2684_s30  }
  0x6e   : > { %s561_s4 = scalar_lea.sflag [#allocation3], %s2942_s1  ;;  %s2529_s23 = scalar_lea.vmem %s572_s29, 256 }
  0x6f   : > { %p2518_p10 = pneg %p2954_p6  ;;  %p2530_p5 = scmp.ne.s32.totalorder %s572_s29, %s2529_s23 }
  0x70   : > { %s2693_s6 = smov [#allocation2]  }
  0x71   : > { %s570_s8 = scalar_lea.hbm %s3330_s7, %s2038_s10  ;;  %p2532_p13 = pnand %p2530_p5, %p2518_p10 }
  0x72   : > { %s2534_s7 = sshll.u32 %s2693_s6, 4  ;;  %s2535_s7 = int_to_ptr.vmem [resolvable:$false] %s2534_s7 }
  0x73   : > { %p2533_p0 = pneg %p2532_p13  ;;  %s2536_s21 = scalar_lea.vmem %s2535_s7, 512 }
  0x74   : > { %p2537_p12 = scmp.lt.s32.totalorder %s572_s29, %s2535_s7  ;;  %p2538_p2 = scmp.lt.s32.totalorder %s2536_s21, %s2529_s23 }
  0x76   : > { %p2539_p7 = por %p2538_p2, %p2537_p12 }
  0x78   : > { %p2540_p11 = pnand %p2539_p7, %p2533_p0 }
  0x7a   : > { %2543 = shalt.err (!%p2540_p11)
}
  0x7b   : > { %s2694_s17 = smov 128   ;;  %s2695_s12 = smov 8  }
  0x7c   : > { %2232 = dma.hbm_to_vmem [thread:$0]  (!%p2954_p6), %s570_s8, 256, %s572_s29, %s561_s4, %s2694_s17, %s2694_s17, %s2695_s12  }
  0x7d   : > { %s1986_s10 = sshll.u32 %s2680_s0, 4  ;;  %s584_s15 = scalar_lea.vmem [#allocation5], %s2942_s1 }
  0x7e   : > { %s591_s14 = sshll.u32 %s584_s15, 4  ;;  %s589_s24 = scalar_lea.hbm %s3268_s2, %s1986_s10  ;;  %s592_s14 = int_to_ptr.vmem [resolvable:$true] %s591_s14 }
  0x7f   : > { %s582_s23 = scalar_lea.sflag [#allocation6], %s581_s16  ;;  %s2557_s7 = scalar_lea.vmem %s592_s14, 16 }
  0x80   : > { %p2558_p1 = scmp.ne.s32.totalorder %s592_s14, %s2557_s7  ;;  %s2696_s21 = smov [#allocation5]  }
  0x81   : > { %s2562_s30 = sshll.u32 %s2696_s21, 4  ;;  %s2563_s30 = int_to_ptr.vmem [resolvable:$false] %s2562_s30 }
  0x82   : > { %p2560_p5 = pnand %p2558_p1, %p2518_p10  ;;  %s2564_s20 = scalar_lea.vmem %s2563_s30, 32 }
  0x83   : > { %p2565_p0 = scmp.lt.s32.totalorder %s592_s14, %s2563_s30  ;;  %p2566_p12 = scmp.lt.s32.totalorder %s2564_s20, %s2557_s7 }
  0x84   : > { %p2561_p13 = pneg %p2560_p5 }
  0x85   : > { %p2567_p2 = por %p2566_p12, %p2565_p0 }
  0x87   : > { %p2568_p7 = pnand %p2567_p2, %p2561_p13 }
  0x89   : > { %2571 = shalt.err (!%p2568_p7)
}
  0x8a   : > { %2235 = dma.hbm_to_vmem [thread:$0]  (!%p2954_p6), %s589_s24, 16, %s592_s14, %s582_s23  }
  0x8b   : > { %600 = sbr.rel (%p2845_p3) target bundleno = 3696 (0xe70), region = 88  ;;  %s2980_s8 = sand.u32 (!%p2845_p3), 1, %s2660_s25  }
  0x8c   : > { %s1988_s26 = sshll.u32 (!%p2845_p3), %s2980_s8, 4  ;;  %s603_s29 = scalar_lea.sflag (!%p2845_p3), [#allocation3], %s2980_s8 }
  0x8d   : > { %s2984_s4 = scalar_lea.vmem (!%p2845_p3), [#allocation2], %s1988_s26 }
  0x90   : > { %2631 = dma.done.wait (%p2924_p4), %s603_s29, 256  }
  0x91   : > { %2633 = vsyncadd (%p2924_p4), %s603_s29, 4294967040  ;;  %s611_s24 = sand.u32 1, %s2840_s18  }
  0x92   : > { %s612_s30 = scalar_lea.sflag [#allocation6], %s611_s24 }
  0x93   : > { %2635 = dma.done.wait (%p2924_p4), %s612_s30, 16  }
  0x94   : > { %2637 = vsyncadd (%p2924_p4), %s612_s30, 4294967280  ;;  %p3332_p3 = scmp.eq.s32.totalorder %s2840_s18, 0 }
  0x96   : > { %2639 = dma.done.wait (%p3332_p3), [#allocation6], 16   ;;  %p3333_p6 = pmov %p3332_p3 }
  0x97   : > { %p3334_p10 = pmov %p3332_p3 }
  0x98   : > { %2641 = vsyncadd (%p3333_p6), [#allocation6], 4294967280 }
  0x99   : > { %2643 = dma.done.wait (%p3334_p10), [#allocation9], 272   ;;  %p3335_p11 = pmov %p3332_p3 }
  0x9a   : > { %p3336_p1 = pmov %p3332_p3 }
  0x9b   : > { %2645 = vsyncadd (%p3335_p11), [#allocation9], 4294967024 }
  0x9c   : > { %2647 = dma.done.wait (%p3336_p1), [#allocation12], 272   ;;  %p3337_p5 = pmov %p3336_p1 }
  0x9d   : > { %p694_p4 = scmp.lt.s32.totalorder %s2672_s28, 1  ;;  %s3338_s1 = sld [smem:[#allocation30_spill]] }
  0x9e   : > { %2649 = vsyncadd (%p3337_p5), [#allocation12], 4294967024  ;;  %s3012_s16 = scalar_lea.vmem [#allocation14], %s1988_s26  ;;  %p1997_p13 = scmp.ne.s32.totalorder %s2668_s27, 0 }
  0x9f   : > { %s695_s19 = scalar_select %p694_p4, %s2672_s28, 1 }
  0xa0   : > { %703 = sbr.rel (%p1997_p13) target bundleno = 167 (0xa7), region = 120 }
  0xa1   : > { %s2039_s22 = sshll.u32 %s695_s19, 4 }
  0xa3   : > { %s698_s14 = scalar_lea.vmem %s3338_s1, %s2039_s22 }
  0xa5   : > { %v704_v0 = vld [vmem:[%s698_s14] sm:$0xff]  ;;  %vm706_vm0 = vcmask 261120   ;;  %v705_v1 = vld [vmem:[%s698_s14 + $0x8] sm:$0xff] }
  0xa6   : > { %707 = vst.msk [vmem:[%s3012_s16] sm:$0xff] %vm706_vm0, %v704_v0  ;;  %708 = vst.msk [vmem:[%s3012_s16 + $0x8] sm:$0xff] %vm706_vm0, %v705_v1 }
  0xa7 PF: > { %v2336_v2 = vld [vmem:[%s3269_s3 + $0x8] sm:$0xff]   ;;  %v2697_v3 = vmov 0.0   ;;  %v2337_v4 = vld [vmem:[%s3269_s3] sm:$0xff]   ;;  %vm2698_vm1 = vmmov 0   ;;  %vm739_vm2 = vcmask 261120   ;;  %s2699_s10 = smov 120  }
  0xa8   : > { %2079 = vmatprep.subr.bf16.mxu0 %v2697_v3  ;;  %2087 = vmatprep.subr.bf16.mxu1 %v2697_v3  ;;  %v711_v7 = vld [vmem:[%s2984_s4] sm:$0xff]  ;;  %v712_v8 = vld [vmem:[%s2984_s4 + $0x8] sm:$0xff]  ;;  %s2700_s15 = smov 96   ;;  %s2701_s6 = smov 88   ;;  %vm861_vm3 = vcmask 64512   ;;  %vm909_vm4 = vcmask 130048  }
  0xa9   : > { %2080 = vmatpush3.bf16.msra.mxu0 %v2336_v2  ;;  %2083 = vmatprep.mubr.msk.bf16.mxu0 %vm2698_vm1, %v2697_v3  ;;  %v1998_v13 = vld [vmem:[#allocation7] ss:$0 sm:$0xff]  ;;  %v2338_v20 = vld [vmem:[#allocation8 + $0x8] sm:$0xff]   ;;  %v2339_v21 = vld [vmem:[#allocation8] sm:$0xff]   ;;  %s2702_s23 = smov 80   ;;  %s2703_s7 = smov 112  }
  0xaa   : > { %2081 = vmatprep.subr.bf16.mxu0 %v2697_v3  ;;  %2091 = vmatprep.mubr.msk.bf16.mxu1 %vm2698_vm1, %v2697_v3  ;;  %v2002_v40 = vld [vmem:[#allocation10] ss:$0 sm:$0xff]  ;;  %vm1104_vm5 = vcmask 1043456   ;;  %s2704_s21 = smov 104   ;;  %s2705_s26 = smov 72   ;;  %vm1704_vm6 = vcmask 523264  }
  0xab   : > { %2088 = vmatpush3.bf16.msra.mxu1 %v2338_v20  ;;  %s3339_s18 = sld [smem:[#allocation39_spill]]  ;;  %s2040_s14 = sshll.u32 %s2672_s28, 8 }
  0xac   : > { %2089 = vmatprep.subr.bf16.mxu1 %v2697_v3  ;;  %s3341_s4 = sld [smem:[#allocation38_spill]]  ;;  %s2706_s28 = smov [#allocation14]  }
  0xad   : > { %v3028_v5 = vld [vmem:[%s3012_s16] sm:$0xff]  ;;  %v3031_v6 = vld [vmem:[%s3012_s16 + $0x8] sm:$0xff]  ;;  %2082 = vmatpush3.bf16.msra.mxu0 %v2337_v4  ;;  %s3342_s19 = sld [smem:[#allocation40_spill]] }
  0xae   : > { %v713_v9 = vadd.f32 %v711_v7, %v3028_v5  ;;  %v714_v10 = vadd.f32 %v712_v8, %v3031_v6  ;;  %2095 = vmatprep.subr.bf16.mxu0 %v2697_v3  ;;  %v784_v22 = vpack.c.bf16 %v3031_v6, %v3028_v5  ;;  %s3343_s20 = sld [smem:[#allocation41_spill]] }
  0xaf   : > { %2090 = vmatpush3.bf16.msra.mxu1 %v2339_v21  ;;  %s3345_s12 = sld [smem:[#allocation42_spill]] }
  0xb0   : > { %v715_v11 = vpack.c.bf16 %v714_v10, %v713_v9  ;;  %2101 = vmatprep.subr.bf16.mxu1 %v2697_v3 }
  0xb2   : > { %2084 = vmatmul.mubr.msk.bf16.vlgmr.msra.gmra.mxu0 %vm739_vm2, %v715_v11  ;;  %2092 = vmatmul.mubr.msk.bf16.vlgmr.msra.gmra.mxu1 %vm739_vm2, %v784_v22 }
  0xb3   : > { %2097 = vmatprep.mubr.msk.bf16.mxu0 %vm2698_vm1, %v2697_v3  ;;  %2103 = vmatprep.mubr.msk.bf16.mxu1 %vm2698_vm1, %v2697_v3 }
 0x172   : > { %v777_v12 = vpop.f32.mrf.mxu0  ;;  %v845_v41 = vpop.f32.mrf.mxu1 }
 0x173   : > { %v778_v16 = vadd.f32 %v1998_v13, %v777_v12  ;;  %v846_v43 = vadd.f32 %v2002_v40, %v845_v41 }
 0x174   : > { %v2085_v14 = vpop.f32.mrf.mxu0  ;;  %v2093_v42 = vpop.f32.mrf.mxu1 }
 0x176   : > { %v780_v15 = vpop.f32.mrf.mxu0  ;;  %v848_v44 = vpop.f32.mrf.mxu1 }
 0x177   : > { %v781_v17 = vadd.f32 %v1998_v13, %v780_v15  ;;  %v849_v45 = vadd.f32 %v2002_v40, %v848_v44 }
 0x178   : > { %v2086_v18 = vpop.f32.mrf.mxu0  ;;  %v2094_v46 = vpop.f32.mrf.mxu1 }
 0x179   : > { %v3044_v19 = vpack.c.bf16 %v781_v17, %v778_v16  ;;  %v3072_v47 = vpack.c.bf16 %v849_v45, %v846_v43 }
 0x17b   : > { %978 = vrot.lane.b32.xlu1 %v3044_v19, %s2699_s10  ;;  %859 = vrot.lane.b32.xlu0 %v3044_v19, %s2700_s15  ;;  %s1798_s15 = scalar_lea.sflag [#allocation4], %s2980_s8 }
 0x17c   : > { %2102 = vmatpush3.bf16.msra.mxu1 %v3072_v47 }
 0x17d   : > { %2113 = vmatprep.subr.bf16.mxu1 %v2697_v3 }
 0x17f   : > { %980 = vrot.lane.b32.xlu0 %v3044_v19, %s2701_s6 }
 0x1ed   : > { %v860_v23 = vpop.permute.xlu0 %859  ;;  %v979_v27 = vpop.permute.xlu1 %978 }
 0x1ee   : > { %v866_v24 = vsel %vm861_vm3, %v860_v23, 0  ;;  %v854_v23 = vld [vmem:[#allocation11] sm:$0xf] }
 0x1ef   : > { %2096 = vmatpush3.bf16.xpose.msra.mxu0 %v866_v24  ;;  %v1153_v24 = vsel %vm1104_vm5, %v854_v23, 0 }
 0x1f0   : > { %2107 = vmatprep.subr.bf16.mxu0 %v2697_v3 }
 0x1f1   : > { %v981_v25 = vpop.permute.xlu0 %980 }
 0x1f2   : > { %v986_v26 = vsel %vm861_vm3, %v981_v25, 0  ;;  %v855_v25 = vld [vmem:[#allocation11 + $0x4] sm:$0xf] }
 0x1f6   : > { %2098 = vmatmul.mubr.msk.bf16.vlgmr.msra.gmra.mxu0 %vm861_vm3, %v3044_v19 }
 0x1f7   : > { %2108 = vmatpush3.bf16.xpose.msra.mxu0 %v986_v26  ;;  %2109 = vmatprep.mubr.msk.bf16.mxu0 %vm2698_vm1, %v2697_v3  ;;  %v1106_v26 = vsel %vm1104_vm5, %v855_v25, 0 }
 0x1f8   : > { %2119 = vmatprep.subr.bf16.mxu0 %v2697_v3 }
 0x1fe   : > { %2110 = vmatmul.mubr.msk.bf16.vlgmr.msra.gmra.mxu0 %vm861_vm3, %v979_v27 }
 0x1ff   : > { %2121 = vmatprep.mubr.msk.bf16.mxu0 %vm2698_vm1, %v2697_v3  ;;  %2120 = vmatpush3.bf16.msra.mxu0 %v1106_v26 }
 0x200   : > { %2131 = vmatprep.subr.bf16.mxu0 %v2697_v3 }
 0x2b6   : > { %v902_v28 = vpop.f32.mrf.mxu0 }
 0x2b7   : > { %v910_v29 = vsel %vm909_vm4, %v902_v28, -inf }
 0x2b8   : > { %911 = vmax.xlane.f32.xlu1 %v910_v29  ;;  %v2099_v30 = vpop.f32.mrf.mxu0 }
 0x2ba   : > { %v905_v31 = vpop.f32.mrf.mxu0 }
 0x2bb   : > { %v913_v32 = vsel %vm909_vm4, %v905_v31, -inf }
 0x2bc   : > { %914 = vmax.xlane.f32.xlu0 %v913_v32  ;;  %v2100_v33 = vpop.f32.mrf.mxu0 }
 0x2be   : > { %v1022_v34 = vpop.f32.mrf.mxu0 }
 0x2bf   : > { %v1029_v35 = vsel %vm909_vm4, %v1022_v34, -inf }
 0x2c0   : > { %1030 = vmax.xlane.f32.xlu0 %v1029_v35  ;;  %v2111_v36 = vpop.f32.mrf.mxu0 }
 0x2c2   : > { %v1025_v37 = vpop.f32.mrf.mxu0 }
 0x2c3   : > { %v1032_v38 = vsel %vm909_vm4, %v1025_v37, -inf }
 0x2c4   : > { %1033 = vmax.xlane.f32.xlu1 %v1032_v38  ;;  %v2112_v39 = vpop.f32.mrf.mxu0 }
 0x341   : > { %v912_v48 = vpop.xlane.xlu1 %911 }
 0x342   : > { %v916_v49 = vsub.f32 %v902_v28, %v912_v48 }
 0x344   : > { %v918_v50 = vmul.f32 1.442695, %v916_v49 }
 0x345   : > { %v915_v51 = vpop.xlane.xlu0 %914 }
 0x346   : > { %2346 = vpow2.f32 %v918_v50  ;;  %v917_v52 = vsub.f32 %v905_v31, %v915_v51 }
 0x348   : > { %v920_v53 = vmul.f32 1.442695, %v917_v52 }
 0x349   : > { %v1031_v54 = vpop.xlane.xlu0 %1030 }
 0x34a   : > { %2348 = vpow2.f32 %v920_v53  ;;  %v1035_v55 = vsub.f32 %v1022_v34, %v1031_v54 }
 0x34c   : > { %v1037_v56 = vmul.f32 1.442695, %v1035_v55 }
 0x34d   : > { %v1034_v57 = vpop.xlane.xlu1 %1033 }
 0x34e   : > { %2350 = vpow2.f32 %v1037_v56  ;;  %v1036_v58 = vsub.f32 %v1025_v37, %v1034_v57 }
 0x350   : > { %v1039_v59 = vmul.f32 1.442695, %v1036_v58 }
 0x352   : > { %2352 = vpow2.f32 %v1039_v59 }
 0x353   : > { %v2347_v60 = vpop.eup %2346 }
 0x354   : > { %v922_v61 = vsel %vm909_vm4, %v2347_v60, 0.0 }
 0x355   : > { %923 = vadd.xlane.f32.xlu0 %v922_v61 }
 0x357   : > { %v2349_v62 = vpop.eup %2348 }
 0x358   : > { %v925_v63 = vsel %vm909_vm4, %v2349_v62, 0.0 }
 0x359   : > { %926 = vadd.xlane.f32.xlu1 %v925_v63 }
 0x35b   : > { %v2351_v0 = vpop.eup %2350 }
 0x35c   : > { %v1041_v1 = vsel %vm909_vm4, %v2351_v0, 0.0 }
 0x35d   : > { %1042 = vadd.xlane.f32.xlu0 %v1041_v1 }
 0x35f   : > { %v2353_v2 = vpop.eup %2352 }
 0x360   : > { %v1044_v4 = vsel %vm909_vm4, %v2353_v2, 0.0 }
 0x361   : > { %1045 = vadd.xlane.f32.xlu1 %v1044_v4 }
 0x372   : > { %1198 = vrot.lane.b32.xlu1 %v3044_v19, %s2702_s23  ;;  %s2576_s23 = sshll.u32 %s2706_s28, 4  ;;  %s2577_s23 = int_to_ptr.vmem [resolvable:$false] %s2576_s23 }
 0x373   : > { %1053 = vrot.lane.b32.xlu0 %v3072_v47, %s2699_s10  ;;  %s3209_s10 = scalar_lea.hbm %s3345_s12, %s2040_s14 }
 0x376   : > { %1196 = vrot.lane.b32.xlu1 %v3044_v19, %s2703_s7 }
 0x3de   : > { %v924_v7 = vpop.xlane.xlu0 %923 }
 0x3df   : > { %2354 = vrcp.f32 %v924_v7 }
 0x3e2   : > { %v927_v8 = vpop.xlane.xlu1 %926 }
 0x3e3   : > { %2356 = vrcp.f32 %v927_v8 }
 0x3e6   : > { %v1043_v9 = vpop.xlane.xlu0 %1042 }
 0x3e7   : > { %2358 = vrcp.f32 %v1043_v9 }
 0x3ea   : > { %v1046_v10 = vpop.xlane.xlu1 %1045  ;;  %v1054_v15 = vpop.permute.xlu0 %1053 }
 0x3eb   : > { %2360 = vrcp.f32 %v1046_v10 }
 0x3ec   : > { %v2355_v11 = vpop.eup %2354 }
 0x3ed   : > { %v930_v13 = vmul.f32 %v2355_v11, %v2347_v60 }
 0x3ee   : > { %v1199_v34 = vpop.permute.xlu1 %1198 }
 0x3ef   : > { %v1204_v38 = vsel %vm861_vm3, %v1199_v34, 0 }
 0x3f0   : > { %v2357_v12 = vpop.eup %2356 }
 0x3f1   : > { %v931_v14 = vmul.f32 %v2357_v12, %v2349_v62 }
 0x3f2   : > { %v1197_v39 = vpop.permute.xlu1 %1196 }
 0x3f3   : > { %v932_v16 = vpack.c.bf16 %v931_v14, %v930_v13 }
 0x3f4   : > { %v2359_v17 = vpop.eup %2358 }
 0x3f5   : > { %2104 = vmatmul.mubr.msk.bf16.vlgmr.msra.gmra.mxu1 %vm909_vm4, %v932_v16  ;;  %v1049_v20 = vmul.f32 %v2359_v17, %v2351_v0  ;;  %v856_v16 = vld [vmem:[#allocation11 + $0x8] sm:$0xf] }
 0x3f6   : > { %2114 = vmatpush3.bf16.msra.mxu1 %v1054_v15  ;;  %2115 = vmatprep.mubr.msk.bf16.mxu1 %vm2698_vm1, %v2697_v3  ;;  %v1322_v17 = vsel %vm1104_vm5, %v856_v16, 0 }
 0x3f7   : > { %2125 = vmatprep.subr.bf16.mxu1 %v2697_v3 }
 0x3f8   : > { %v2361_v18 = vpop.eup %2360 }
 0x3f9   : > { %v1050_v21 = vmul.f32 %v2361_v18, %v2353_v2 }
 0x3fb   : > { %v1051_v22 = vpack.c.bf16 %v1050_v21, %v1049_v20 }
 0x3fd   : > { %2116 = vmatmul.mubr.msk.bf16.vlgmr.msra.gmra.mxu1 %vm909_vm4, %v1051_v22 }
 0x3fe   : > { %2127 = vmatprep.mubr.msk.bf16.mxu1 %vm2698_vm1, %v2697_v3  ;;  %2126 = vmatpush3.bf16.msra.mxu1 %v1153_v24 }
 0x3ff   : > { %2137 = vmatprep.subr.bf16.mxu1 %v2697_v3 }
 0x4b5   : > { %v970_v27 = vpop.f32.mrf.mxu1 }
 0x4b7   : > { %v2105_v28 = vpop.f32.mrf.mxu1 }
 0x4b9   : > { %v973_v29 = vpop.f32.mrf.mxu1 }
 0x4ba   : > { %v977_v30 = vpack.c.bf16 %v973_v29, %v970_v27 }
 0x4bb   : > { %v2106_v31 = vpop.f32.mrf.mxu1 }
 0x4bc   : > { %2128 = vmatmul.mubr.msk.bf16.vlgmr.msra.gmra.mxu1 %vm861_vm3, %v977_v30 }
 0x4bd   : > { %v1093_v32 = vpop.f32.mrf.mxu1  ;;  %2139 = vmatprep.mubr.msk.bf16.mxu1 %vm2698_vm1, %v2697_v3 }
 0x4bf   : > { %v2117_v33 = vpop.f32.mrf.mxu1 }
 0x4c1   : > { %v1096_v35 = vpop.f32.mrf.mxu1 }
 0x4c2   : > { %v1100_v36 = vpack.c.bf16 %v1096_v35, %v1093_v32 }
 0x4c3   : > { %v2118_v37 = vpop.f32.mrf.mxu1 }
 0x4c4   : > { %2122 = vmatmul.mubr.msk.bf16.vlgmr.msra.gmra.mxu0 %vm861_vm3, %v1100_v36 }
 0x4c5   : > { %2132 = vmatpush3.bf16.xpose.msra.mxu0 %v1204_v38  ;;  %2133 = vmatprep.mubr.msk.bf16.mxu0 %vm2698_vm1, %v2697_v3 }
 0x4c6   : > { %2143 = vmatprep.subr.bf16.mxu0 %v2697_v3 }
 0x4cc   : > { %2134 = vmatmul.mubr.msk.bf16.vlgmr.msra.gmra.mxu0 %vm861_vm3, %v1197_v39 }
 0x4cd   : > { %2145 = vmatprep.mubr.msk.bf16.mxu0 %vm2698_vm1, %v2697_v3  ;;  %2144 = vmatpush3.bf16.msra.mxu0 %v1322_v17 }
 0x4ce   : > { %2155 = vmatprep.subr.bf16.mxu0 %v2697_v3 }
 0x57c   : > { %v1189_v40 = vpop.f32.mrf.mxu1 }
 0x57e   : > { %v2129_v41 = vpop.f32.mrf.mxu1 }
 0x580   : > { %v1192_v42 = vpop.f32.mrf.mxu1 }
 0x582   : > { %v2130_v43 = vpop.f32.mrf.mxu1 }
 0x584   : > { %v1142_v44 = vpop.f32.mrf.mxu0 }
 0x585   : > { %v3107_v45 = vadd.f32 %v1189_v40, %v1142_v44 }
 0x586   : > { %v2123_v46 = vpop.f32.mrf.mxu0 }
 0x588   : > { %v1145_v48 = vpop.f32.mrf.mxu0 }
 0x589   : > { %v3109_v49 = vadd.f32 %v1192_v42, %v1145_v48 }
 0x58a   : > { %v2124_v50 = vpop.f32.mrf.mxu0 }
 0x58c   : > { %v1240_v51 = vpop.f32.mrf.mxu0 }
 0x58d   : > { %v1247_v52 = vsel %vm909_vm4, %v1240_v51, -inf }
 0x58e   : > { %1248 = vmax.xlane.f32.xlu0 %v1247_v52  ;;  %v2135_v53 = vpop.f32.mrf.mxu0 }
 0x590   : > { %v1243_v54 = vpop.f32.mrf.mxu0 }
 0x591   : > { %v1250_v55 = vsel %vm909_vm4, %v1243_v54, -inf }
 0x592   : > { %1251 = vmax.xlane.f32.xlu1 %v1250_v55  ;;  %v2136_v56 = vpop.f32.mrf.mxu0 }
 0x5a3   : > { %1270 = vrot.lane.b32.xlu1 %v3072_v47, %s2703_s7  ;;  %s2578_s7 = scalar_lea.vmem %s2577_s23, 512 }
 0x5a7   : > { %1367 = vrot.lane.b32.xlu1 %v3044_v19, %s2704_s21 }
 0x617   : > { %v1249_v57 = vpop.xlane.xlu0 %1248 }
 0x618   : > { %v1253_v58 = vsub.f32 %v1240_v51, %v1249_v57 }
 0x61a   : > { %v1255_v59 = vmul.f32 1.442695, %v1253_v58 }
 0x61b   : > { %v1252_v60 = vpop.xlane.xlu1 %1251 }
 0x61c   : > { %2362 = vpow2.f32 %v1255_v59  ;;  %v1254_v61 = vsub.f32 %v1243_v54, %v1252_v60 }
 0x61e   : > { %v1257_v62 = vmul.f32 1.442695, %v1254_v61 }
 0x61f   : > { %v1271_v63 = vpop.permute.xlu1 %1270 }
 0x620   : > { %2364 = vpow2.f32 %v1257_v62  ;;  %2138 = vmatpush3.bf16.msra.mxu1 %v1271_v63  ;;  %v2018_v62 = vld [vmem:[#allocation13] ss:$0 sm:$0xff] }
 0x621   : > { %2149 = vmatprep.subr.bf16.mxu1 %v2697_v3 }
 0x629   : > { %v2363_v0 = vpop.eup %2362 }
 0x62a   : > { %v1259_v1 = vsel %vm909_vm4, %v2363_v0, 0.0 }
 0x62b   : > { %1260 = vadd.xlane.f32.xlu0 %v1259_v1 }
 0x62d   : > { %v2365_v2 = vpop.eup %2364 }
 0x62e   : > { %v1262_v4 = vsel %vm909_vm4, %v2365_v2, 0.0 }
 0x62f   : > { %1263 = vadd.xlane.f32.xlu0 %v1262_v4 }
 0x645   : > { %1369 = vrot.lane.b32.xlu0 %v3044_v19, %s2705_s26  ;;  %v1368_v19 = vpop.permute.xlu1 %1367 }
 0x6b4   : > { %v1261_v7 = vpop.xlane.xlu0 %1260 }
 0x6b5   : > { %2366 = vrcp.f32 %v1261_v7 }
 0x6b8   : > { %v1264_v8 = vpop.xlane.xlu0 %1263 }
 0x6b9   : > { %2368 = vrcp.f32 %v1264_v8 }
 0x6bc   : > { %v1370_v13 = vpop.permute.xlu0 %1369 }
 0x6bd   : > { %v1375_v15 = vsel %vm861_vm3, %v1370_v13, 0 }
 0x6c2   : > { %v2367_v9 = vpop.eup %2366 }
 0x6c3   : > { %v1267_v11 = vmul.f32 %v2367_v9, %v2363_v0 }
 0x6c6   : > { %v2369_v10 = vpop.eup %2368 }
 0x6c7   : > { %v1268_v12 = vmul.f32 %v2369_v10, %v2365_v2 }
 0x6c9   : > { %v1269_v14 = vpack.c.bf16 %v1268_v12, %v1267_v11 }
 0x6cb   : > { %2140 = vmatmul.mubr.msk.bf16.vlgmr.msra.gmra.mxu1 %vm909_vm4, %v1269_v14 }
 0x6cc   : > { %2150 = vmatpush3.bf16.xpose.msra.mxu1 %v1375_v15  ;;  %2151 = vmatprep.mubr.msk.bf16.mxu1 %vm2698_vm1, %v2697_v3 }
 0x6cd   : > { %2161 = vmatprep.subr.bf16.mxu1 %v2697_v3 }
 0x6d3   : > { %2152 = vmatmul.mubr.msk.bf16.vlgmr.msra.gmra.mxu1 %vm861_vm3, %v1368_v19 }
 0x6d4   : > { %2163 = vmatprep.mubr.msk.bf16.mxu1 %vm2698_vm1, %v2697_v3 }
 0x78b   : > { %v1310_v18 = vpop.f32.mrf.mxu1 }
 0x78d   : > { %v2141_v20 = vpop.f32.mrf.mxu1 }
 0x78f   : > { %v1313_v21 = vpop.f32.mrf.mxu1 }
 0x790   : > { %v1317_v22 = vpack.c.bf16 %v1313_v21, %v1310_v18 }
 0x791   : > { %v2142_v23 = vpop.f32.mrf.mxu1 }
 0x792   : > { %2146 = vmatmul.mubr.msk.bf16.vlgmr.msra.gmra.mxu0 %vm861_vm3, %v1317_v22  ;;  %v2341_v22 = vld [vmem:[%s3275_s9] sm:$0xff]   ;;  %v2342_v23 = vld [vmem:[%s3277_s11 + $0x18] sm:$0xff]  }
 0x793   : > { %v1411_v24 = vpop.f32.mrf.mxu1  ;;  %2157 = vmatprep.mubr.msk.bf16.mxu0 %vm2698_vm1, %v2697_v3 }
 0x794   : > { %v1418_v25 = vsel %vm909_vm4, %v1411_v24, -inf }
 0x795   : > { %1419 = vmax.xlane.f32.xlu1 %v1418_v25  ;;  %v2153_v26 = vpop.f32.mrf.mxu1 }
 0x797   : > { %v1414_v27 = vpop.f32.mrf.mxu1 }
 0x798   : > { %v1421_v28 = vsel %vm909_vm4, %v1414_v27, -inf }
 0x799   : > { %1422 = vmax.xlane.f32.xlu0 %v1421_v28  ;;  %v2154_v29 = vpop.f32.mrf.mxu1 }
 0x81e   : > { %v1420_v30 = vpop.xlane.xlu1 %1419 }
 0x81f   : > { %v1424_v31 = vsub.f32 %v1411_v24, %v1420_v30 }
 0x821   : > { %v1426_v32 = vmul.f32 1.442695, %v1424_v31 }
 0x822   : > { %v1423_v33 = vpop.xlane.xlu0 %1422 }
 0x823   : > { %2370 = vpow2.f32 %v1426_v32  ;;  %v1425_v34 = vsub.f32 %v1414_v27, %v1423_v33  ;;  %v2019_v32 = vld [vmem:[%s3279_s13] ss:$0 sm:$0xff] }
 0x825   : > { %v1428_v35 = vmul.f32 1.442695, %v1425_v34 }
 0x827   : > { %2372 = vpow2.f32 %v1428_v35 }
 0x830   : > { %v2371_v36 = vpop.eup %2370 }
 0x831   : > { %v1430_v37 = vsel %vm909_vm4, %v2371_v36, 0.0 }
 0x832   : > { %1431 = vadd.xlane.f32.xlu0 %v1430_v37 }
 0x834   : > { %v2373_v38 = vpop.eup %2372 }
 0x835   : > { %v1433_v39 = vsel %vm909_vm4, %v2373_v38, 0.0 }
 0x836   : > { %1434 = vadd.xlane.f32.xlu1 %v1433_v39 }
 0x848   : > { %1441 = vrot.lane.b32.xlu0 %v3072_v47, %s2704_s21  ;;  %s3340_s21 = sld [smem:[#allocation37_spill]] }
 0x852   : > { %v1358_v40 = vpop.f32.mrf.mxu0 }
 0x853   : > { %v1365_v41 = vadd.f32 %v1358_v40, %v3107_v45  ;;  %v857_v45 = vld [vmem:[#allocation11 + $0xc] sm:$0xf] }
 0x854   : > { %v2147_v42 = vpop.f32.mrf.mxu0 }
 0x855   : > { %v2344_v42 = vld [vmem:[%s3277_s11 + $0x8] sm:$0xff]  }
 0x856   : > { %v1361_v43 = vpop.f32.mrf.mxu0 }
 0x857   : > { %v1366_v44 = vadd.f32 %v1361_v43, %v3109_v49  ;;  %v1493_v49 = vsel %vm1104_vm5, %v857_v45, 0  ;;  %v2345_v43 = vld [vmem:[%s3277_s11] sm:$0xff]  }
 0x858   : > { %v2148_v46 = vpop.f32.mrf.mxu0  ;;  %2162 = vmatpush3.bf16.msra.mxu1 %v1493_v49 }
 0x859   : > { %2175 = vmatprep.subr.bf16.mxu1 %v2697_v3 }
 0x8bb   : > { %v1432_v48 = vpop.xlane.xlu0 %1431 }
 0x8bc   : > { %2374 = vrcp.f32 %v1432_v48 }
 0x8bf   : > { %v1435_v50 = vpop.xlane.xlu1 %1434  ;;  %v1442_v51 = vpop.permute.xlu0 %1441 }
 0x8c0   : > { %2376 = vrcp.f32 %v1435_v50  ;;  %2156 = vmatpush3.bf16.msra.mxu0 %v1442_v51 }
 0x8c1   : > { %2167 = vmatprep.subr.bf16.mxu0 %v2697_v3 }
 0x8c9   : > { %v2375_v52 = vpop.eup %2374 }
 0x8ca   : > { %v1438_v54 = vmul.f32 %v2375_v52, %v2371_v36  ;;  %v2020_v36 = vld [vmem:[%s3339_s18] ss:$0 sm:$0xff]  ;;  %s1811_s18 = sshll.u32 %s3012_s16, 4  ;;  %s3211_s18 = int_to_ptr.vmem [resolvable:$true] %s1811_s18 }
 0x8cb   : > { %s2572_s6 = scalar_lea.vmem %s3211_s18, 256  ;;  %p2579_p7 = scmp.lt.s32.totalorder %s3211_s18, %s2577_s23 }
 0x8cc   : > { %p2573_p0 = scmp.ne.s32.totalorder %s3211_s18, %s2572_s6  ;;  %p2580_p3 = scmp.lt.s32.totalorder %s2578_s7, %s2572_s6 }
 0x8cd   : > { %v2377_v53 = vpop.eup %2376 }
 0x8ce   : > { %v1439_v47 = vmul.f32 %v2377_v53, %v2373_v38  ;;  %p2574_p12 = pnand %p2573_p0, %p2930_p8  ;;  %p2581_p6 = por %p2580_p3, %p2579_p7 }
 0x8d0   : > { %v1440_v55 = vpack.c.bf16 %v1439_v47, %v1438_v54  ;;  %p2575_p2 = pneg %p2574_p12 }
 0x8d2   : > { %2158 = vmatmul.mubr.msk.bf16.vlgmr.msra.gmra.mxu0 %vm909_vm4, %v1440_v55  ;;  %p2582_p10 = pnand %p2581_p6, %p2575_p2 }
 0x8d3   : > { %2171 = vmatprep.mubr.msk.bf16.mxu0 %vm2698_vm1, %v2697_v3 }
 0x992   : > { %v1481_v56 = vpop.f32.mrf.mxu0 }
 0x994   : > { %v2159_v57 = vpop.f32.mrf.mxu0 }
 0x996   : > { %v1484_v58 = vpop.f32.mrf.mxu0 }
 0x997   : > { %v1488_v59 = vpack.c.bf16 %v1484_v58, %v1481_v56 }
 0x998   : > { %v2160_v60 = vpop.f32.mrf.mxu0 }
 0x999   : > { %2164 = vmatmul.mubr.msk.bf16.vlgmr.msra.gmra.mxu1 %vm861_vm3, %v1488_v59 }
 0x99a   : > { %2183 = vmatprep.mubr.msk.bf16.mxu1 %vm2698_vm1, %v2697_v3  ;;  %2176 = vmatpush3.bf16.msra.mxu1 %v2342_v23 }
 0x99b   : > { %2177 = vmatprep.subr.bf16.mxu1 %v2697_v3 }
 0xa59   : > { %v1529_v61 = vpop.f32.mrf.mxu1 }
 0xa5a   : > { %v1536_v63 = vadd.f32 %v1529_v61, %v1365_v41  ;;  %v2343_v41 = vld [vmem:[%s3277_s11 + $0x10] sm:$0xff]  }
 0xa5b   : > { %v2165_v0 = vpop.f32.mrf.mxu1  ;;  %2178 = vmatpush3.bf16.msra.mxu1 %v2343_v41 }
 0xa5c   : > { %v1545_v1 = vadd.f32 %v2018_v62, %v1536_v63  ;;  %2179 = vmatprep.subr.bf16.mxu1 %v2697_v3 }
 0xa5d   : > { %v1532_v2 = vpop.f32.mrf.mxu1 }
 0xa5e   : > { %v1537_v4 = vadd.f32 %v1532_v2, %v1366_v44  ;;  %v1547_v7 = vadd.f32 %v1545_v1, %v3028_v5  ;;  %v2021_v44 = vld [vmem:[%s3340_s21] ss:$0 sm:$0xff] }
 0xa5f   : > { %v2166_v8 = vpop.f32.mrf.mxu1  ;;  %2180 = vmatpush3.bf16.msra.mxu1 %v2344_v42 }
 0xa60   : > { %v1546_v9 = vadd.f32 %v2018_v62, %v1537_v4  ;;  %v1551_v10 = vsel %vm739_vm2, %v1547_v7, 0.0  ;;  %2181 = vmatprep.subr.bf16.mxu1 %v2697_v3 }
 0xa61   : > { %1552 = vadd.xlane.f32.xlu1 %v1551_v10 }
 0xa62   : > { %v1548_v11 = vadd.f32 %v1546_v9, %v3031_v6  ;;  %v2340_v6 = vld [vmem:[%s3275_s9 + $0x8] sm:$0xff]  }
 0xa63   : > { %2168 = vmatpush3.bf16.msra.mxu0 %v2340_v6  ;;  %2182 = vmatpush3.bf16.msra.mxu1 %v2345_v43 }
 0xa64   : > { %v1554_v12 = vsel %vm739_vm2, %v1548_v11, 0.0  ;;  %2169 = vmatprep.subr.bf16.mxu0 %v2697_v3  ;;  %v2025_v3 = vld [vmem:[%s3341_s4] ss:$0 sm:$0xff] }
 0xa65   : > { %1555 = vadd.xlane.f32.xlu1 %v1554_v12 }
 0xa67   : > { %2170 = vmatpush3.bf16.msra.mxu0 %v2341_v22 }
 0xaea   : > { %v1553_v13 = vpop.xlane.xlu1 %1552 }
 0xaeb   : > { %v1558_v14 = vmul.f32 0.03125, %v1553_v13 }
 0xaed   : > { %v1560_v15 = vsub.f32 %v1547_v7, %v1558_v14 }
 0xaee   : > { %v1556_v19 = vpop.xlane.xlu1 %1555 }
 0xaef   : > { %v1559_v16 = vmul.f32 0.03125, %v1556_v19  ;;  %v1562_v17 = vmul.f32 %v1560_v15, %v1560_v15 }
 0xaf1   : > { %v1561_v18 = vsub.f32 %v1548_v11, %v1559_v16  ;;  %v1564_v20 = vsel %vm739_vm2, %v1562_v17, 0.0 }
 0xaf2   : > { %1565 = vadd.xlane.f32.xlu1 %v1564_v20  ;;  %v2031_v20 = vld [vmem:[%s3342_s19] ss:$0 sm:$0xff] }
 0xaf3   : > { %v1563_v5 = vmul.f32 %v1561_v18, %v1561_v18 }
 0xaf5   : > { %v1567_v21 = vsel %vm739_vm2, %v1563_v5, 0.0 }
 0xaf6   : > { %1568 = vadd.xlane.f32.xlu1 %v1567_v21  ;;  %v2032_v21 = vld [vmem:[%s3343_s20] ss:$0 sm:$0xff] }
 0xb7b   : > { %v1566_v24 = vpop.xlane.xlu1 %1565 }
 0xb7c   : > { %v1570_v25 = vmul.f32 0.03125, %v1566_v24 }
 0xb7e   : > { %v1572_v26 = vadd.f32 1e-05, %v1570_v25 }
 0xb7f   : > { %v1569_v27 = vpop.xlane.xlu1 %1568 }
 0xb80   : > { %2378 = vrsqrt.f32 %v1572_v26  ;;  %v1571_v28 = vmul.f32 0.03125, %v1569_v27 }
 0xb82   : > { %v1573_v29 = vadd.f32 1e-05, %v1571_v28 }
 0xb84   : > { %2380 = vrsqrt.f32 %v1573_v29 }
 0xb8d   : > { %v2379_v30 = vpop.eup %2378 }
 0xb8e   : > { %v1576_v31 = vmul.f32 %v2379_v30, %v1560_v15 }
 0xb90   : > { %v1584_v35 = vmul.f32 %v2019_v32, %v1576_v31 }
 0xb91   : > { %v2381_v33 = vpop.eup %2380 }
 0xb92   : > { %v1577_v34 = vmul.f32 %v2381_v33, %v1561_v18  ;;  %v1592_v38 = vadd.f32 %v2020_v36, %v1584_v35 }
 0xb94   : > { %v1585_v37 = vmul.f32 %v2019_v32, %v1577_v34 }
 0xb96   : > { %v1593_v39 = vadd.f32 %v2020_v36, %v1585_v37 }
 0xb98   : > { %v1594_v40 = vpack.c.bf16 %v1593_v39, %v1592_v38 }
 0xb9a   : > { %2172 = vmatmul.mubr.msk.bf16.vlgmr.msra.gmra.mxu0 %vm739_vm2, %v1594_v40 }
 0xc5a   : > { %v1655_v46 = vpop.f32.mrf.mxu0 }
 0xc5b   : > { %v1656_v50 = vadd.f32 %v2021_v44, %v1655_v46 }
 0xc5c   : > { %v2173_v48 = vpop.f32.mrf.mxu0 }
 0xc5d   : > { %v1662_v54 = vmax.f32 %v1656_v50, 0.0 }
 0xc5e   : > { %v1658_v51 = vpop.f32.mrf.mxu0 }
 0xc5f   : > { %v1659_v52 = vadd.f32 %v2021_v44, %v1658_v51 }
 0xc60   : > { %v2174_v53 = vpop.f32.mrf.mxu0 }
 0xc61   : > { %v1663_v47 = vmax.f32 %v1659_v52, 0.0 }
 0xc63   : > { %v1664_v55 = vpack.c.bf16 %v1663_v47, %v1662_v54 }
 0xc65   : > { %2184 = vmatmul.mubr.msk.bf16.vlgmr.msra.gmra.mxu1 %vm1704_vm6, %v1664_v55 }
 0xd25   : > { %v1742_v45 = vpop.f32.mrf.mxu1 }
 0xd26   : > { %v1743_v49 = vadd.f32 %v2025_v3, %v1742_v45 }
 0xd27   : > { %v2185_v56 = vpop.f32.mrf.mxu1 }
 0xd28   : > { %v1749_v57 = vadd.f32 %v1743_v49, %v1592_v38 }
 0xd29   : > { %v1745_v58 = vpop.f32.mrf.mxu1 }
 0xd2a   : > { %v1746_v59 = vadd.f32 %v2025_v3, %v1745_v58  ;;  %v1753_v60 = vsel %vm739_vm2, %v1749_v57, 0.0 }
 0xd2b   : > { %1754 = vadd.xlane.f32.xlu1 %v1753_v60  ;;  %v2186_v61 = vpop.f32.mrf.mxu1 }
 0xd2c   : > { %v1750_v62 = vadd.f32 %v1746_v59, %v1593_v39 }
 0xd2e   : > { %v1756_v63 = vsel %vm739_vm2, %v1750_v62, 0.0 }
 0xd2f   : > { %1757 = vadd.xlane.f32.xlu1 %v1756_v63 }
 0xdb4   : > { %v1755_v0 = vpop.xlane.xlu1 %1754 }
 0xdb5   : > { %v1759_v1 = vmul.f32 0.03125, %v1755_v0 }
 0xdb7   : > { %v1761_v2 = vsub.f32 %v1749_v57, %v1759_v1 }
 0xdb8   : > { %v1758_v4 = vpop.xlane.xlu1 %1757 }
 0xdb9   : > { %v1760_v7 = vmul.f32 0.03125, %v1758_v4  ;;  %v1763_v8 = vmul.f32 %v1761_v2, %v1761_v2 }
 0xdbb   : > { %v1762_v9 = vsub.f32 %v1750_v62, %v1760_v7  ;;  %v1765_v10 = vsel %vm739_vm2, %v1763_v8, 0.0 }
 0xdbc   : > { %1766 = vadd.xlane.f32.xlu0 %v1765_v10 }
 0xdbd   : > { %v1764_v11 = vmul.f32 %v1762_v9, %v1762_v9 }
 0xdbf   : > { %v1768_v12 = vsel %vm739_vm2, %v1764_v11, 0.0 }
 0xdc0   : > { %1769 = vadd.xlane.f32.xlu1 %v1768_v12 }
 0xe45   : > { %v1767_v13 = vpop.xlane.xlu0 %1766 }
 0xe46   : > { %v1771_v14 = vmul.f32 0.03125, %v1767_v13 }
 0xe48   : > { %v1773_v15 = vadd.f32 1e-05, %v1771_v14 }
 0xe49   : > { %v1770_v19 = vpop.xlane.xlu1 %1769 }
 0xe4a   : > { %2382 = vrsqrt.f32 %v1773_v15  ;;  %v1772_v16 = vmul.f32 0.03125, %v1770_v19 }
 0xe4c   : > { %v1774_v17 = vadd.f32 1e-05, %v1772_v16 }
 0xe4e   : > { %2384 = vrsqrt.f32 %v1774_v17 }
 0xe57   : > { %v2383_v18 = vpop.eup %2382 }
 0xe58   : > { %v1777_v5 = vmul.f32 %v2383_v18, %v1761_v2 }
 0xe5a   : > { %v1785_v6 = vmul.f32 %v2031_v20, %v1777_v5 }
 0xe5b   : > { %v2385_v22 = vpop.eup %2384 }
 0xe5c   : > { %v1778_v23 = vmul.f32 %v2385_v22, %v1762_v9  ;;  %v1793_v24 = vadd.f32 %v2032_v21, %v1785_v6 }
 0xe5e   : > { %v1786_v25 = vmul.f32 %v2031_v20, %v1778_v23  ;;  %1795 = vst.msk [vmem:[%s3012_s16] sm:$0xff] %vm739_vm2, %v1793_v24 }
 0xe60   : > { %v1794_v26 = vadd.f32 %v2032_v21, %v1786_v25 }
 0xe62   : > { %1796 = vst.msk [vmem:[%s3012_s16 + $0x8] sm:$0xff] %vm739_vm2, %v1794_v26 }
 0xe63   : > { %2585 = shalt.err (!%p2582_p10)
}
 0xe64   : > { %s2586_s16 = scalar_lea.hbm %s3209_s10, 256  ;;  %s2590_s29 = scalar_lea.hbm %s3345_s12, 512 }
 0xe65   : > { %p2587_p11 = scmp.ne.s32.totalorder %s3209_s10, %s2586_s16  ;;  %p2591_p4 = scmp.lt.s32.totalorder %s3209_s10, %s3345_s12 }
 0xe66   : > { %p2592_p13 = scmp.lt.s32.totalorder %s2590_s29, %s2586_s16 }
 0xe67   : > { %p2588_p1 = pnand %p2587_p11, %p2930_p8 }
 0xe68   : > { %p2593_p0 = por %p2592_p13, %p2591_p4 }
 0xe69   : > { %p2589_p5 = pneg %p2588_p1 }
 0xe6b   : > { %p2594_p12 = pnand %p2593_p0, %p2589_p5 }
 0xe6d   : > { %2597 = shalt.err (!%p2594_p12)
}
 0xe6e   : > { %s2707_s30 = smov 128   ;;  %s2708_s19 = smov 8  }
 0xe6f   : > { %2211 = dma.vmem_to_hbm [thread:$0]  (%p2930_p8), %s3211_s18, 256, %s3209_s10, %s1798_s15, %s2707_s30, %s2707_s30, %s2708_s19  }
 0xe70 PF: > { %s3346_s22 = sld [smem:[#allocation24_spill]] }
 0xe71   : > { %s3347_s5 = sld [smem:[#allocation21_spill]] }
 0xe76   : > { %p2251_p2 = scmp.ge.s32.totalorder %s3346_s22, 2 }
 0xe77   : > { %s1826_s14 = sand.u32 1, %s3347_s5  }
 0xe78   : > { %p2237_p7 = pnand %p2251_p2, %p2934_p9  ;;  %s1827_s17 = scalar_lea.sflag [#allocation4], %s1826_s14 }
 0xe7a   : > { %p2238_p3 = pneg %p2237_p7 }
 0xe7c   : > { %2651 = dma.done.wait (%p2238_p3), %s1827_s17, 256  }
 0xe7d   : > { %2653 = vsyncadd (%p2238_p3), %s1827_s17, 4294967040  ;;  %s38_s30 = sadd.s32 1, %s3346_s22   ;;  %s3349_s27 = sld [smem:[#allocation22_spill]] }
 0xe7e   : > { %p35_p6 = scmp.ge.s32.totalorder %s38_s30, 6   ;;  %s3350_s26 = sld [smem:[#allocation29_spill]] }
 0xe7f   : > { %s3351_s8 = sld [smem:[#allocation23_spill]]  ;;  %s3354_s24 = smov %s2660_s25 }
 0xe80   : > { %s3352_s29 = sld [smem:[#allocation25_spill]]  ;;  %s3357_s28 = smov %s2680_s0 }
 0xe81   : > { %s3353_s1 = sld [smem:[#allocation26_spill]] }
 0xe83   : > { %s3355_s25 = smov %s3349_s27  ;;  %37 = sbr.rel (!%p35_p6) target bundleno = 25 (0x19), region = 173 }
 0xe85   : > { %s3356_s27 = smov %s3351_s8 }
 0xe87   : > { %s3358_s0 = smov %s3353_s1 }
 0xe88   :  { %1832 = vsyncpa [#allocation3], 1 }
 0xe89   :  { %1834 = vsyncpa [#allocation3 + $0x1], 1 }
 0xe8a   :  { %1835 = vsyncpa [#allocation6], 1 }
 0xe8b   :  { %1837 = vsyncpa [#allocation6 + $0x1], 1 }
 0xe8c   :  { %1838 = vsyncpa [#allocation9], 1 }
 0xe8d   :  { %1839 = vsyncpa [#allocation12], 1 }
 0xe8e   :  { %1840 = vsyncpa [#allocation4], 1 }
 0xe8f   :  { %1842 = vsyncpa [#allocation4 + $0x1], 1 }

</bundles_post_ra>
